<compile_context>
chip_gen: v6e
topology: v6e:2x2x1
jax: 0.10.0
libtpu: 0.0.40
codegen_flags: <defaults>
</compile_context>

<pallas_src>
import jax
import jax.numpy as jnp
from jax.experimental import pallas as pl
from jax.experimental.pallas import tpu as pltpu

IN_F, H0, H1 = 1000, 512, 256
EPS = 1e-5
P_DROP = 0.5


def _batchnorm(x, gamma, beta):
    # nn.BatchNorm1d in training mode: per-feature batch stats, biased variance.
    mean = jnp.mean(x, axis=0, keepdims=True)
    var = jnp.mean((x - mean) ** 2, axis=0, keepdims=True)
    return gamma * (x - mean) * jax.lax.rsqrt(var + EPS) + beta


def regressor_kernel(x_ref, m0_ref, m1_ref, m2_ref,
                     w0_ref, b0_ref,
                     w1_ref, b1_ref, g1_ref, be1_ref,
                     w2_ref, b2_ref, g2_ref, be2_ref,
                     out_ref):
    # Dropout masks already carry the 1/(1-p)=2 keep-scale (values are 0 or 2).
    # TODO(synk): F.dropout2d on a 2-D input has PyTorch-version-dependent
    # "channel" semantics; plain elementwise dropout (p=0.5) is used here.
    x = x_ref[...] * m0_ref[...]
    h = jnp.dot(x.astype(jnp.bfloat16), w0_ref[...],
                preferred_element_type=jnp.float32) + b0_ref[...]
    h = jnp.maximum(h, 0.0)                                            # relu(lin0(.))

    h = h * m1_ref[...]
    h = jnp.dot(h.astype(jnp.bfloat16), w1_ref[...],
                preferred_element_type=jnp.float32) + b1_ref[...]
    h = jnp.maximum(_batchnorm(h, g1_ref[...], be1_ref[...]), 0.0)     # relu(bn1(lin1(.)))

    h = h * m2_ref[...]
    h = jnp.dot(h.astype(jnp.bfloat16), w2_ref[...],
                preferred_element_type=jnp.float32) + b2_ref[...]
    out_ref[...] = jnp.maximum(_batchnorm(h, g2_ref[...], be2_ref[...]), 0.0)  # relu(bn2(lin2(.)))


def regressor_r18_forward(x, params, dropout_key):
    """Training-mode forward of Regressor_R18 as one Pallas invocation."""
    B = x.shape[0]
    nd = params["w2"].shape[1]

    # Dropout masks with the keep-scale folded in, generated with the portable
    # JAX PRNG (no TPU-only stateful PRNG primitives inside the kernel).
    k0, k1, k2 = jax.random.split(dropout_key, 3)
    scale = 1.0 / (1.0 - P_DROP)
    m0 = jax.random.bernoulli(k0, 1.0 - P_DROP, (B, IN_F)).astype(jnp.float32) * scale
    m1 = jax.random.bernoulli(k1, 1.0 - P_DROP, (B, H0)).astype(jnp.float32) * scale
    m2 = jax.random.bernoulli(k2, 1.0 - P_DROP, (B, H1)).astype(jnp.float32) * scale

    args = (x, m0, m1, m2,
            params["w0"], params["b0"],
            params["w1"], params["b1"], params["g1"], params["be1"],
            params["w2"], params["b2"], params["g2"], params["be2"])
    vmem = pl.BlockSpec(memory_space=pltpu.MemorySpace.VMEM)
    return pl.pallas_call(
        regressor_kernel,
        out_shape=jax.ShapeDtypeStruct((B, nd), jnp.float32),
        in_specs=[vmem] * len(args),
        out_specs=vmem,
    )(*args)


def init_params(key, no_domain):
    # PyTorch-style init: U(-1/sqrt(fan_in), 1/sqrt(fan_in)).
    # Weights stored pre-transposed (in, out) and in bfloat16 (weight-stream is
    # the bottleneck at small batch); biases / BN params stay f32.
    ks = jax.random.split(key, 6)

    def lin(kw, kb, fan_in, fan_out):
        bound = 1.0 / jnp.sqrt(fan_in)
        w = jax.random.uniform(kw, (fan_in, fan_out), jnp.float32, -bound, bound)
        b = jax.random.uniform(kb, (1, fan_out), jnp.float32, -bound, bound)
        return w.astype(jnp.bfloat16), b

    w0, b0 = lin(ks[0], ks[1], IN_F, H0)
    w1, b1 = lin(ks[2], ks[3], H0, H1)
    w2, b2 = lin(ks[4], ks[5], H1, no_domain)
    return dict(
        w0=w0, b0=b0,
        w1=w1, b1=b1,
        g1=jnp.ones((1, H1), jnp.float32), be1=jnp.zeros((1, H1), jnp.float32),
        w2=w2, b2=b2,
        g2=jnp.ones((1, no_domain), jnp.float32),
        be2=jnp.zeros((1, no_domain), jnp.float32),
    )


if __name__ == "__main__":
    no_domain = 16
    batch = 8

    key = jax.random.PRNGKey(0)
    kx, kp, kd = jax.random.split(key, 3)
    x = jax.random.normal(kx, (batch, IN_F), dtype=jnp.float32)
    params = init_params(kp, no_domain)

    out = regressor_r18_forward(x, params, kd)
    out = jax.block_until_ready(out)
    assert out.shape == (batch, no_domain)
    assert bool(jnp.all(out >= 0.0))          # final ReLU
    assert bool(jnp.all(jnp.isfinite(out)))
    print("KERNEL_OK")
</pallas_src>

<mosaic_0001>
module attributes {stable_mosaic.version = 11 : i64} {
  func.func @regressor_kernel(%arg0: memref<8x1000xf32, #tpu.memory_space<vmem>>, %arg1: memref<8x1000xf32, #tpu.memory_space<vmem>>, %arg2: memref<8x512xf32, #tpu.memory_space<vmem>>, %arg3: memref<8x256xf32, #tpu.memory_space<vmem>>, %arg4: memref<1000x512xbf16, #tpu.memory_space<vmem>>, %arg5: memref<1x512xf32, #tpu.memory_space<vmem>>, %arg6: memref<512x256xbf16, #tpu.memory_space<vmem>>, %arg7: memref<1x256xf32, #tpu.memory_space<vmem>>, %arg8: memref<1x256xf32, #tpu.memory_space<vmem>>, %arg9: memref<1x256xf32, #tpu.memory_space<vmem>>, %arg10: memref<256x16xbf16, #tpu.memory_space<vmem>>, %arg11: memref<1x16xf32, #tpu.memory_space<vmem>>, %arg12: memref<1x16xf32, #tpu.memory_space<vmem>>, %arg13: memref<1x16xf32, #tpu.memory_space<vmem>>, %arg14: memref<8x16xf32, #tpu.memory_space<vmem>>) attributes {dimension_semantics = [], scalar_prefetch = 0 : i64, scratch_operands = 0 : i64, tpu.core_type = #tpu.core_type<tc>} {
    %c0 = arith.constant 0 : index
    %c0_0 = arith.constant 0 : index
    %0 = vector.load %arg0[%c0, %c0_0] : memref<8x1000xf32, #tpu.memory_space<vmem>>, vector<8x1000xf32>
    %c0_1 = arith.constant 0 : index
    %c0_2 = arith.constant 0 : index
    %1 = vector.load %arg1[%c0_1, %c0_2] : memref<8x1000xf32, #tpu.memory_space<vmem>>, vector<8x1000xf32>
    %2 = arith.mulf %0, %1 : vector<8x1000xf32>
    %3 = arith.truncf %2 : vector<8x1000xf32> to vector<8x1000xbf16>
    %c0_3 = arith.constant 0 : index
    %c0_4 = arith.constant 0 : index
    %4 = vector.load %arg4[%c0_3, %c0_4] : memref<1000x512xbf16, #tpu.memory_space<vmem>>, vector<1000x512xbf16>
    %cst = arith.constant dense<0.000000e+00> : vector<8x512xf32>
    %5 = tpu.matmul %3, %4, %cst {dimension_numbers = #tpu.dot_dimension_numbers<[1], [0], [0], [1], [0, 0, 1, 1], [], []>} : vector<8x1000xbf16>, vector<1000x512xbf16>, vector<8x512xf32> -> vector<8x512xf32>
    %c0_5 = arith.constant 0 : index
    %c0_6 = arith.constant 0 : index
    %6 = vector.load %arg5[%c0_5, %c0_6] : memref<1x512xf32, #tpu.memory_space<vmem>>, vector<1x512xf32>
    %7 = vector.broadcast %6 : vector<1x512xf32> to vector<8x512xf32>
    %8 = arith.addf %5, %7 : vector<8x512xf32>
    %cst_7 = arith.constant 0.000000e+00 : f32
    %9 = vector.broadcast %cst_7 : f32 to vector<8x512xf32>
    %10 = arith.maximumf %8, %9 : vector<8x512xf32>
    %c0_8 = arith.constant 0 : index
    %c0_9 = arith.constant 0 : index
    %11 = vector.load %arg2[%c0_8, %c0_9] : memref<8x512xf32, #tpu.memory_space<vmem>>, vector<8x512xf32>
    %12 = arith.mulf %10, %11 : vector<8x512xf32>
    %13 = arith.truncf %12 : vector<8x512xf32> to vector<8x512xbf16>
    %c0_10 = arith.constant 0 : index
    %c0_11 = arith.constant 0 : index
    %14 = vector.load %arg6[%c0_10, %c0_11] : memref<512x256xbf16, #tpu.memory_space<vmem>>, vector<512x256xbf16>
    %cst_12 = arith.constant dense<0.000000e+00> : vector<8x256xf32>
    %15 = tpu.matmul %13, %14, %cst_12 {dimension_numbers = #tpu.dot_dimension_numbers<[1], [0], [0], [1], [0, 0, 1, 1], [], []>} : vector<8x512xbf16>, vector<512x256xbf16>, vector<8x256xf32> -> vector<8x256xf32>
    %c0_13 = arith.constant 0 : index
    %c0_14 = arith.constant 0 : index
    %16 = vector.load %arg7[%c0_13, %c0_14] : memref<1x256xf32, #tpu.memory_space<vmem>>, vector<1x256xf32>
    %17 = vector.broadcast %16 : vector<1x256xf32> to vector<8x256xf32>
    %18 = arith.addf %15, %17 : vector<8x256xf32>
    %c0_15 = arith.constant 0 : index
    %c0_16 = arith.constant 0 : index
    %19 = vector.load %arg8[%c0_15, %c0_16] : memref<1x256xf32, #tpu.memory_space<vmem>>, vector<1x256xf32>
    %c0_17 = arith.constant 0 : index
    %c0_18 = arith.constant 0 : index
    %20 = vector.load %arg9[%c0_17, %c0_18] : memref<1x256xf32, #tpu.memory_space<vmem>>, vector<1x256xf32>
    %cst_19 = arith.constant dense<0.000000e+00> : vector<256xf32>
    %21 = vector.multi_reduction <add>, %18, %cst_19 [0] : vector<8x256xf32> to vector<256xf32>
    %22 = vector.shape_cast %21 : vector<256xf32> to vector<1x256xf32>
    %cst_20 = arith.constant 8.000000e+00 : f32
    %23 = vector.broadcast %cst_20 : f32 to vector<1x256xf32>
    %24 = arith.divf %22, %23 : vector<1x256xf32>
    %25 = vector.broadcast %24 : vector<1x256xf32> to vector<8x256xf32>
    %26 = arith.subf %18, %25 : vector<8x256xf32>
    %27 = arith.mulf %26, %26 : vector<8x256xf32>
    %cst_21 = arith.constant dense<0.000000e+00> : vector<256xf32>
    %28 = vector.multi_reduction <add>, %27, %cst_21 [0] : vector<8x256xf32> to vector<256xf32>
    %29 = vector.shape_cast %28 : vector<256xf32> to vector<1x256xf32>
    %cst_22 = arith.constant 8.000000e+00 : f32
    %30 = vector.broadcast %cst_22 : f32 to vector<1x256xf32>
    %31 = arith.divf %29, %30 : vector<1x256xf32>
    %32 = vector.broadcast %24 : vector<1x256xf32> to vector<8x256xf32>
    %33 = arith.subf %18, %32 : vector<8x256xf32>
    %34 = vector.broadcast %19 : vector<1x256xf32> to vector<8x256xf32>
    %35 = arith.mulf %34, %33 : vector<8x256xf32>
    %cst_23 = arith.constant 9.99999974E-6 : f32
    %36 = vector.broadcast %cst_23 : f32 to vector<1x256xf32>
    %37 = arith.addf %31, %36 : vector<1x256xf32>
    %38 = math.rsqrt %37 : vector<1x256xf32>
    %39 = vector.broadcast %38 : vector<1x256xf32> to vector<8x256xf32>
    %40 = arith.mulf %35, %39 : vector<8x256xf32>
    %41 = vector.broadcast %20 : vector<1x256xf32> to vector<8x256xf32>
    %42 = arith.addf %40, %41 : vector<8x256xf32>
    %cst_24 = arith.constant 0.000000e+00 : f32
    %43 = vector.broadcast %cst_24 : f32 to vector<8x256xf32>
    %44 = arith.maximumf %42, %43 : vector<8x256xf32>
    %c0_25 = arith.constant 0 : index
    %c0_26 = arith.constant 0 : index
    %45 = vector.load %arg3[%c0_25, %c0_26] : memref<8x256xf32, #tpu.memory_space<vmem>>, vector<8x256xf32>
    %46 = arith.mulf %44, %45 : vector<8x256xf32>
    %47 = arith.truncf %46 : vector<8x256xf32> to vector<8x256xbf16>
    %c0_27 = arith.constant 0 : index
    %c0_28 = arith.constant 0 : index
    %48 = vector.load %arg10[%c0_27, %c0_28] : memref<256x16xbf16, #tpu.memory_space<vmem>>, vector<256x16xbf16>
    %cst_29 = arith.constant dense<0.000000e+00> : vector<8x16xf32>
    %49 = tpu.matmul %47, %48, %cst_29 {dimension_numbers = #tpu.dot_dimension_numbers<[1], [0], [0], [1], [0, 0, 1, 1], [], []>} : vector<8x256xbf16>, vector<256x16xbf16>, vector<8x16xf32> -> vector<8x16xf32>
    %c0_30 = arith.constant 0 : index
    %c0_31 = arith.constant 0 : index
    %50 = vector.load %arg11[%c0_30, %c0_31] : memref<1x16xf32, #tpu.memory_space<vmem>>, vector<1x16xf32>
    %51 = vector.broadcast %50 : vector<1x16xf32> to vector<8x16xf32>
    %52 = arith.addf %49, %51 : vector<8x16xf32>
    %c0_32 = arith.constant 0 : index
    %c0_33 = arith.constant 0 : index
    %53 = vector.load %arg12[%c0_32, %c0_33] : memref<1x16xf32, #tpu.memory_space<vmem>>, vector<1x16xf32>
    %c0_34 = arith.constant 0 : index
    %c0_35 = arith.constant 0 : index
    %54 = vector.load %arg13[%c0_34, %c0_35] : memref<1x16xf32, #tpu.memory_space<vmem>>, vector<1x16xf32>
    %cst_36 = arith.constant dense<0.000000e+00> : vector<16xf32>
    %55 = vector.multi_reduction <add>, %52, %cst_36 [0] : vector<8x16xf32> to vector<16xf32>
    %56 = vector.shape_cast %55 : vector<16xf32> to vector<1x16xf32>
    %cst_37 = arith.constant 8.000000e+00 : f32
    %57 = vector.broadcast %cst_37 : f32 to vector<1x16xf32>
    %58 = arith.divf %56, %57 : vector<1x16xf32>
    %59 = vector.broadcast %58 : vector<1x16xf32> to vector<8x16xf32>
    %60 = arith.subf %52, %59 : vector<8x16xf32>
    %61 = arith.mulf %60, %60 : vector<8x16xf32>
    %cst_38 = arith.constant dense<0.000000e+00> : vector<16xf32>
    %62 = vector.multi_reduction <add>, %61, %cst_38 [0] : vector<8x16xf32> to vector<16xf32>
    %63 = vector.shape_cast %62 : vector<16xf32> to vector<1x16xf32>
    %cst_39 = arith.constant 8.000000e+00 : f32
    %64 = vector.broadcast %cst_39 : f32 to vector<1x16xf32>
    %65 = arith.divf %63, %64 : vector<1x16xf32>
    %66 = vector.broadcast %58 : vector<1x16xf32> to vector<8x16xf32>
    %67 = arith.subf %52, %66 : vector<8x16xf32>
    %68 = vector.broadcast %53 : vector<1x16xf32> to vector<8x16xf32>
    %69 = arith.mulf %68, %67 : vector<8x16xf32>
    %cst_40 = arith.constant 9.99999974E-6 : f32
    %70 = vector.broadcast %cst_40 : f32 to vector<1x16xf32>
    %71 = arith.addf %65, %70 : vector<1x16xf32>
    %72 = math.rsqrt %71 : vector<1x16xf32>
    %73 = vector.broadcast %72 : vector<1x16xf32> to vector<8x16xf32>
    %74 = arith.mulf %69, %73 : vector<8x16xf32>
    %75 = vector.broadcast %54 : vector<1x16xf32> to vector<8x16xf32>
    %76 = arith.addf %74, %75 : vector<8x16xf32>
    %cst_41 = arith.constant 0.000000e+00 : f32
    %77 = vector.broadcast %cst_41 : f32 to vector<8x16xf32>
    %78 = arith.maximumf %76, %77 : vector<8x16xf32>
    %c0_42 = arith.constant 0 : index
    %c0_43 = arith.constant 0 : index
    %79 = vector.load %arg14[%c0_42, %c0_43] : memref<8x16xf32, #tpu.memory_space<vmem>>, vector<8x16xf32>
    tpu.vector_store %arg14[%c0_42, %c0_43], %78 {strides = array<i32>} : memref<8x16xf32, #tpu.memory_space<vmem>>, vector<8x16xf32>,
    return
  }
}

</mosaic_0001>

<bundles_post_ra>
// kernel: tpu_custom_call.1
= control target key start
LH: loop header
LB: loop body
LE: loop exit
PB: predicated region body
PF: predicated region fallthrough
CT: control target
= control target key end

     0   :  { %19 = vsyncpa [#allocation3], 0  ;;  %s4132_s0 = inlined_call_operand.vmem [shape: f32[8,1000], index: 0, kind: input, shape index: {}]   ;;  %s4133_s1 = inlined_call_operand.vmem [shape: f32[8,1000], index: 1, kind: input, shape index: {}]   ;;  %s4134_s2 = inlined_call_operand.hbm [shape: f32[8,512], index: 2, kind: input, shape index: {}]   ;;  %s4135_s3 = inlined_call_operand.vmem [shape: f32[8,256], index: 3, kind: input, shape index: {}]   ;;  %s4136_s4 = inlined_call_operand.hbm [shape: bf16[1000,512], index: 4, kind: input, shape index: {}]   ;;  %s4137_s5 = inlined_call_operand.hbm [shape: f32[1,512], index: 5, kind: input, shape index: {}]   ;;  %s4138_s6 = inlined_call_operand.hbm [shape: bf16[512,256], index: 6, kind: input, shape index: {}]   ;;  %s4139_s7 = inlined_call_operand.vmem [shape: f32[1,256], index: 7, kind: input, shape index: {}]   ;;  %s4140_s8 = inlined_call_operand.hbm [shape: f32[1,256], index: 8, kind: input, shape index: {}]   ;;  %s4141_s9 = inlined_call_operand.hbm [shape: f32[1,256], index: 9, kind: input, shape index: {}]   ;;  %s4142_s10 = inlined_call_operand.vmem [shape: bf16[256,16], index: 10, kind: input, shape index: {}]   ;;  %s4143_s11 = inlined_call_operand.vmem [shape: f32[1,16], index: 11, kind: input, shape index: {}]   ;;  %s4144_s12 = inlined_call_operand.vmem [shape: f32[1,16], index: 12, kind: input, shape index: {}]   ;;  %s4145_s13 = inlined_call_operand.vmem [shape: f32[1,16], index: 13, kind: input, shape index: {}]   ;;  %s4146_s14 = inlined_call_operand.hbm [shape: f32[8,16], index: 14, kind: output, shape index: {}]  }
   0x1   :  { %20 = vsyncpa [#allocation6], 0 }
   0x2   :  { %21 = vsyncpa [#allocation9], 0 }
   0x3   :  { %22 = vsyncpa [#allocation12], 0 }
   0x4   :  { %23 = vsyncpa [#allocation4], 0  ;;  %s3840_s29 = smov [#allocation5]  }
   0x5   :  { %s45_s30 = sshll.u32 %s3840_s29, 4  ;;  %s46_s30 = int_to_ptr.vmem [resolvable:$true] %s45_s30 }
   0x6   :  { %s3698_s15 = scalar_lea.vmem %s46_s30, 32000  ;;  %p3703_p1 = scmp.lt.s32.totalorder %s46_s30, %s46_s30 }
   0x7   :  { %p3699_p0 = scmp.ne.s32.totalorder %s46_s30, %s3698_s15  ;;  %p3704_p2 = scmp.lt.s32.totalorder %s3698_s15, %s3698_s15 }
   0x9   :  { %p3705_p3 = por %p3704_p2, %p3703_p1 }
   0xb   :  { %p3706_p4 = pnand %p3705_p3, %p3699_p0 }
   0xd   :  { %3709 = shalt.err (!%p3706_p4)
}
   0xe   :  { %s3841_s16 = smov 256   ;;  %s3842_s17 = smov 16  }
   0xf   :  { %51 = dma.hbm_to_vmem [thread:$0]  %s4136_s4, 32000, %s46_s30, [#allocation6], %s3841_s16, %s3841_s16, %s3842_s17  }
  0x10   :  { %s3843_s20 = smov [#allocation8]  }
  0x11   :  { %s67_s21 = sshll.u32 %s3843_s20, 4  ;;  %s68_s21 = int_to_ptr.vmem [resolvable:$true] %s67_s21 }
  0x12   :  { %s3718_s22 = scalar_lea.vmem %s68_s21, 8192  ;;  %p3723_p6 = scmp.lt.s32.totalorder %s68_s21, %s68_s21 }
  0x13   :  { %p3719_p5 = scmp.ne.s32.totalorder %s68_s21, %s3718_s22  ;;  %p3724_p7 = scmp.lt.s32.totalorder %s3718_s22, %s3718_s22 }
  0x15   :  { %p3725_p8 = por %p3724_p7, %p3723_p6 }
  0x17   :  { %p3726_p9 = pnand %p3725_p8, %p3719_p5 }
  0x19   :  { %3729 = shalt.err (!%p3726_p9)
}
  0x1a   :  { %s3844_s23 = smov 128   ;;  %s3845_s24 = smov 8  }
  0x1b   :  { %73 = dma.hbm_to_vmem [thread:$0]  %s4138_s6, 8192, %s68_s21, [#allocation9], %s3844_s23, %s3844_s23, %s3845_s24  }
  0x1c   :  { %s3846_s27 = smov [#allocation2]   ;;  %s3847_s29 = smov [#allocation7]  }
  0x1d   :  { %s34_s28 = sshll.u32 %s3846_s27, 4  ;;  %s58_s4 = sshll.u32 %s3847_s29, 4  ;;  %s35_s28 = int_to_ptr.vmem [resolvable:$true] %s34_s28  ;;  %s59_s4 = int_to_ptr.vmem [resolvable:$true] %s58_s4 }
  0x1e   :  { %s3738_s30 = scalar_lea.vmem %s35_s28, 512  ;;  %p3743_p11 = scmp.lt.s32.totalorder %s35_s28, %s35_s28 }
  0x1f   :  { %p3739_p10 = scmp.ne.s32.totalorder %s35_s28, %s3738_s30  ;;  %p3744_p12 = scmp.lt.s32.totalorder %s3738_s30, %s3738_s30 }
  0x21   :  { %p3745_p13 = por %p3744_p12, %p3743_p11 }
  0x23   :  { %p3746_p0 = pnand %p3745_p13, %p3739_p10 }
  0x25   :  { %3749 = shalt.err (!%p3746_p0)
}
  0x26   :  { %37 = dma.hbm_to_vmem [thread:$0]  %s4134_s2, 512, %s35_s28, [#allocation3]  }
  0x27   :  { %s3758_s17 = scalar_lea.vmem %s59_s4, 64  ;;  %p3763_p2 = scmp.lt.s32.totalorder %s59_s4, %s59_s4 }
  0x28   :  { %p3759_p1 = scmp.ne.s32.totalorder %s59_s4, %s3758_s17  ;;  %p3764_p3 = scmp.lt.s32.totalorder %s3758_s17, %s3758_s17 }
  0x2a   :  { %p3765_p4 = por %p3764_p3, %p3763_p2 }
  0x2c   :  { %p3766_p5 = pnand %p3765_p4, %p3759_p1 }
  0x2e   :  { %3769 = shalt.err (!%p3766_p5)
}
  0x2f   :  { %61 = dma.hbm_to_vmem [thread:$0]  %s4137_s5, 64, %s59_s4, [#allocation6]  }
  0x30   :  { %s3848_s19 = smov [#allocation10]   ;;  %s3849_s21 = smov [#allocation11]  }
  0x31   :  { %s82_s20 = sshll.u32 %s3848_s19, 4  ;;  %s92_s22 = sshll.u32 %s3849_s21, 4  ;;  %s83_s20 = int_to_ptr.vmem [resolvable:$true] %s82_s20  ;;  %s93_s22 = int_to_ptr.vmem [resolvable:$true] %s92_s22 }
  0x32   :  { %s3778_s23 = scalar_lea.vmem %s83_s20, 32  ;;  %p3783_p7 = scmp.lt.s32.totalorder %s83_s20, %s83_s20 }
  0x33   :  { %p3779_p6 = scmp.ne.s32.totalorder %s83_s20, %s3778_s23  ;;  %p3784_p8 = scmp.lt.s32.totalorder %s3778_s23, %s3778_s23 }
  0x35   :  { %p3785_p9 = por %p3784_p8, %p3783_p7 }
  0x37   :  { %p3786_p10 = pnand %p3785_p9, %p3779_p6 }
  0x39   :  { %3789 = shalt.err (!%p3786_p10)
}
  0x3a   :  { %85 = dma.hbm_to_vmem [thread:$0]  %s4140_s8, 32, %s83_s20, [#allocation9]  }
  0x3b   :  { %s3798_s25 = scalar_lea.vmem %s93_s22, 32  ;;  %p3803_p12 = scmp.lt.s32.totalorder %s93_s22, %s93_s22 }
  0x3c   :  { %p3799_p11 = scmp.ne.s32.totalorder %s93_s22, %s3798_s25  ;;  %p3804_p13 = scmp.lt.s32.totalorder %s3798_s25, %s3798_s25 }
  0x3e   :  { %p3805_p0 = por %p3804_p13, %p3803_p12 }
  0x40   :  { %p3806_p1 = pnand %p3805_p0, %p3799_p11 }
  0x42   :  { %3809 = shalt.err (!%p3806_p1)
}
  0x43   :  { %95 = dma.hbm_to_vmem [thread:$0]  %s4141_s9, 32, %s93_s22, [#allocation12]  }
  0x44   :  { %3830 = dma.done.wait [#allocation3], 512  }
  0x45   :  { %3831 = vsyncadd [#allocation3], 4294966784 }
  0x46   :  { %3832 = dma.done.wait [#allocation6], 32064  }
  0x47   :  { %3833 = vsyncadd [#allocation6], 4294935232 }
  0x48   :  { %3834 = dma.done.wait [#allocation9], 8224  }
  0x49   :  { %3835 = vsyncadd [#allocation9], 4294959072 }
  0x4a   :  { %3836 = dma.done.wait [#allocation12], 32  }
  0x4b   :  { %3837 = vsyncadd [#allocation12], 4294967264  ;;  %v3196_v0 = vld [vmem:[#allocation5 + $0xe4] ss:$16 sps:$4 sm:$0xff]   ;;  %v3200_v2 = vld [vmem:[#allocation5 + $0xe0] ss:$16 sps:$4 sm:$0xff]  }
  0x4c   :  { %v3198_v1 = vld [vmem:[#allocation5 + $0x2e4] ss:$16 sps:$4 sm:$0xff]   ;;  %1694 = vmatprep.subr.bf16.mxu0 %v3196_v0  ;;  %v3201_v3 = vld [vmem:[#allocation5 + $0x2e0] ss:$16 sps:$4 sm:$0xff]   ;;  %v124_v46 = vld [vmem:[%s4132_s0 + $0x8] sm:$0xff]  ;;  %vm1677_vm0 = vcmask 850944  }
  0x4d   :  { %1735 = vmatprep.subr.bf16.mxu1 %v3198_v1  ;;  %v3202_v4 = vld [vmem:[#allocation5 + $0xc4] ss:$16 sps:$4 sm:$0xff]   ;;  %1695 = vmatpush1.bf16.msra.mxu0 %v3200_v2  ;;  %v3206_v6 = vld [vmem:[#allocation5 + $0xc0] ss:$16 sps:$4 sm:$0xff]   ;;  %v132_v47 = vld [vmem:[%s4133_s1 + $0x8] sm:$0xff]  ;;  %vm1681_vm1 = vcmask 1043456  }
  0x4e   :  { %1736 = vmatpush1.bf16.msra.mxu1 %v3201_v3  ;;  %v3204_v5 = vld [vmem:[#allocation5 + $0x2c4] ss:$16 sps:$4 sm:$0xff]   ;;  %1696 = vmatprep.subr.bf16.mxu0 %v3202_v4  ;;  %v3207_v7 = vld [vmem:[#allocation5 + $0x2c0] ss:$16 sps:$4 sm:$0xff]   ;;  %v126_v48 = vld [vmem:[%s4132_s0 + $0x18] sm:$0xff]  ;;  %v140_v53 = vmul.f32 %v132_v47, %v124_v46  ;;  %vm2768_vm2 = vcmask 130048  }
  0x4f   :  { %1737 = vmatprep.subr.bf16.mxu1 %v3204_v5  ;;  %v3208_v8 = vld [vmem:[#allocation5 + $0xa4] ss:$16 sps:$4 sm:$0xff]   ;;  %v3212_v10 = vld [vmem:[#allocation5 + $0xa0] ss:$16 sps:$4 sm:$0xff]   ;;  %v134_v49 = vld [vmem:[%s4133_s1 + $0x18] sm:$0xff]  ;;  %s3850_s27 = smov [#allocation13]  }
  0x50   :  { %v3210_v9 = vld [vmem:[#allocation5 + $0x2a4] ss:$16 sps:$4 sm:$0xff]   ;;  %v3213_v11 = vld [vmem:[#allocation5 + $0x2a0] ss:$16 sps:$4 sm:$0xff]   ;;  %v142_v54 = vmul.f32 %v134_v49, %v126_v48  ;;  %v3956_v56 = vpack.c.bf16 %v140_v53, %v140_v53  ;;  %v128_v48 = vld [vmem:[%s4132_s0 + $0x28] sm:$0xff]  ;;  %s2812_s28 = sshll.u32 %s3850_s27, 4  ;;  %s2813_s28 = int_to_ptr.vmem [resolvable:$true] %s2812_s28 }
  0x51   :  { %1697 = vmatpush1.bf16.msra.mxu0 %v3206_v6  ;;  %v3214_v12 = vld [vmem:[#allocation5 + $0x84] ss:$16 sps:$4 sm:$0xff]   ;;  %v3218_v14 = vld [vmem:[#allocation5 + $0x80] ss:$16 sps:$4 sm:$0xff]   ;;  %v136_v49 = vld [vmem:[%s4133_s1 + $0x28] sm:$0xff]  ;;  %s3810_s29 = scalar_lea.vmem %s2813_s28, 128  ;;  %p3815_p3 = scmp.lt.s32.totalorder %s2813_s28, %s2813_s28 }
  0x52   :  { %1738 = vmatpush1.bf16.msra.mxu1 %v3207_v7  ;;  %1698 = vmatprep.subr.bf16.mxu0 %v3208_v8  ;;  %v3216_v13 = vld [vmem:[#allocation5 + $0x284] ss:$16 sps:$4 sm:$0xff]   ;;  %v3219_v15 = vld [vmem:[#allocation5 + $0x280] ss:$16 sps:$4 sm:$0xff]   ;;  %v3958_v57 = vpack.c.bf16 %v142_v54, %v142_v54  ;;  %p3811_p2 = scmp.ne.s32.totalorder %s2813_s28, %s3810_s29  ;;  %p3816_p4 = scmp.lt.s32.totalorder %s3810_s29, %s3810_s29 }
  0x53   :  { %1739 = vmatprep.subr.bf16.mxu1 %v3210_v9  ;;  %v3220_v16 = vld [vmem:[#allocation5 + $0x64] ss:$16 sps:$4 sm:$0xff]   ;;  %v3224_v18 = vld [vmem:[#allocation5 + $0x60] ss:$16 sps:$4 sm:$0xff]   ;;  %1726 = vmatprep.mubr.bf16.mxu0 %v3956_v56 }
  0x54   :  { %v3222_v17 = vld [vmem:[#allocation5 + $0x264] ss:$16 sps:$4 sm:$0xff]   ;;  %v3225_v19 = vld [vmem:[#allocation5 + $0x260] ss:$16 sps:$4 sm:$0xff]   ;;  %1767 = vmatprep.mubr.bf16.mxu1 %v3958_v57  ;;  %p3817_p5 = por %p3816_p4, %p3815_p3 }
  0x55   :  { %1699 = vmatpush1.bf16.msra.mxu0 %v3212_v10  ;;  %v3226_v20 = vld [vmem:[#allocation5 + $0x44] ss:$16 sps:$4 sm:$0xff]   ;;  %v3230_v22 = vld [vmem:[#allocation5 + $0x40] ss:$16 sps:$4 sm:$0xff]  }
  0x56   :  { %1740 = vmatpush1.bf16.msra.mxu1 %v3213_v11  ;;  %1700 = vmatprep.subr.bf16.mxu0 %v3214_v12  ;;  %v3228_v21 = vld [vmem:[#allocation5 + $0x244] ss:$16 sps:$4 sm:$0xff]   ;;  %v3231_v23 = vld [vmem:[#allocation5 + $0x240] ss:$16 sps:$4 sm:$0xff]   ;;  %p3818_p6 = pnand %p3817_p5, %p3811_p2 }
  0x57   :  { %1741 = vmatprep.subr.bf16.mxu1 %v3216_v13  ;;  %v3232_v24 = vld [vmem:[#allocation5 + $0x24] ss:$16 sps:$4 sm:$0xff]   ;;  %v3236_v26 = vld [vmem:[#allocation5 + $0x20] ss:$16 sps:$4 sm:$0xff]  }
  0x58   :  { %v3234_v25 = vld [vmem:[#allocation5 + $0x224] ss:$16 sps:$4 sm:$0xff]   ;;  %v3237_v27 = vld [vmem:[#allocation5 + $0x220] ss:$16 sps:$4 sm:$0xff]  }
  0x59   :  { %1701 = vmatpush1.bf16.msra.mxu0 %v3218_v14  ;;  %v3238_v28 = vld [vmem:[#allocation5 + $0x4] ss:$16 sps:$4 sm:$0xff]   ;;  %v3242_v30 = vld [vmem:[#allocation5] ss:$16 sps:$4 sm:$0xff]  }
  0x5a   :  { %1742 = vmatpush1.bf16.msra.mxu1 %v3219_v15  ;;  %1702 = vmatprep.subr.bf16.mxu0 %v3220_v16  ;;  %v3240_v29 = vld [vmem:[#allocation5 + $0x204] ss:$16 sps:$4 sm:$0xff]   ;;  %v3243_v31 = vld [vmem:[#allocation5 + $0x200] ss:$16 sps:$4 sm:$0xff]  }
  0x5b   :  { %1743 = vmatprep.subr.bf16.mxu1 %v3222_v17  ;;  %v3244_v32 = vld [vmem:[#allocation5 + $0x1e4] ss:$16 sps:$4 sm:$0xff]   ;;  %v3248_v34 = vld [vmem:[#allocation5 + $0x1e0] ss:$16 sps:$4 sm:$0xff]  }
  0x5c   :  { %v3246_v33 = vld [vmem:[#allocation5 + $0x3e4] ss:$16 sps:$4 sm:$0xff]   ;;  %v3249_v35 = vld [vmem:[#allocation5 + $0x3e0] ss:$16 sps:$4 sm:$0xff]  }
  0x5d   :  { %1703 = vmatpush1.bf16.msra.mxu0 %v3224_v18  ;;  %v3250_v36 = vld [vmem:[#allocation5 + $0x1c4] ss:$16 sps:$4 sm:$0xff]   ;;  %v3254_v38 = vld [vmem:[#allocation5 + $0x1c0] ss:$16 sps:$4 sm:$0xff]  }
  0x5e   :  { %1744 = vmatpush1.bf16.msra.mxu1 %v3225_v19  ;;  %1704 = vmatprep.subr.bf16.mxu0 %v3226_v20  ;;  %v3252_v37 = vld [vmem:[#allocation5 + $0x3c4] ss:$16 sps:$4 sm:$0xff]   ;;  %v3255_v39 = vld [vmem:[#allocation5 + $0x3c0] ss:$16 sps:$4 sm:$0xff]  }
  0x5f   :  { %1745 = vmatprep.subr.bf16.mxu1 %v3228_v21  ;;  %v3256_v40 = vld [vmem:[#allocation5 + $0x1a4] ss:$16 sps:$4 sm:$0xff]   ;;  %v3260_v42 = vld [vmem:[#allocation5 + $0x1a0] ss:$16 sps:$4 sm:$0xff]  }
  0x60   :  { %v3258_v41 = vld [vmem:[#allocation5 + $0x3a4] ss:$16 sps:$4 sm:$0xff]   ;;  %v3261_v43 = vld [vmem:[#allocation5 + $0x3a0] ss:$16 sps:$4 sm:$0xff]  }
  0x61   :  { %1705 = vmatpush1.bf16.msra.mxu0 %v3230_v22  ;;  %v3262_v44 = vld [vmem:[#allocation5 + $0x184] ss:$16 sps:$4 sm:$0xff]   ;;  %v3266_v50 = vld [vmem:[#allocation5 + $0x180] ss:$16 sps:$4 sm:$0xff]  }
  0x62   :  { %1746 = vmatpush1.bf16.msra.mxu1 %v3231_v23  ;;  %1706 = vmatprep.subr.bf16.mxu0 %v3232_v24  ;;  %v3264_v45 = vld [vmem:[#allocation5 + $0x384] ss:$16 sps:$4 sm:$0xff]   ;;  %v3267_v51 = vld [vmem:[#allocation5 + $0x380] ss:$16 sps:$4 sm:$0xff]  }
  0x63   :  { %1747 = vmatprep.subr.bf16.mxu1 %v3234_v25  ;;  %v3268_v52 = vld [vmem:[#allocation5 + $0x164] ss:$16 sps:$4 sm:$0xff]   ;;  %v3272_v58 = vld [vmem:[#allocation5 + $0x160] ss:$16 sps:$4 sm:$0xff]  }
  0x64   :  { %v3270_v55 = vld [vmem:[#allocation5 + $0x364] ss:$16 sps:$4 sm:$0xff]   ;;  %v3273_v59 = vld [vmem:[#allocation5 + $0x360] ss:$16 sps:$4 sm:$0xff]  }
  0x65   :  { %1707 = vmatpush1.bf16.msra.mxu0 %v3236_v26  ;;  %v3274_v60 = vld [vmem:[#allocation5 + $0x144] ss:$16 sps:$4 sm:$0xff]   ;;  %v3278_v62 = vld [vmem:[#allocation5 + $0x140] ss:$16 sps:$4 sm:$0xff]  }
  0x66   :  { %1748 = vmatpush1.bf16.msra.mxu1 %v3237_v27  ;;  %1708 = vmatprep.subr.bf16.mxu0 %v3238_v28  ;;  %v3276_v61 = vld [vmem:[#allocation5 + $0x344] ss:$16 sps:$4 sm:$0xff]   ;;  %v3279_v63 = vld [vmem:[#allocation5 + $0x340] ss:$16 sps:$4 sm:$0xff]  }
  0x67   :  { %1749 = vmatprep.subr.bf16.mxu1 %v3240_v29  ;;  %v3280_v0 = vld [vmem:[#allocation5 + $0x124] ss:$16 sps:$4 sm:$0xff]   ;;  %v3284_v2 = vld [vmem:[#allocation5 + $0x120] ss:$16 sps:$4 sm:$0xff]  }
  0x68   :  { %v3282_v1 = vld [vmem:[#allocation5 + $0x324] ss:$16 sps:$4 sm:$0xff]   ;;  %v3285_v3 = vld [vmem:[#allocation5 + $0x320] ss:$16 sps:$4 sm:$0xff]  }
  0x69   :  { %1709 = vmatpush1.bf16.msra.mxu0 %v3242_v30  ;;  %v123_v4 = vld [vmem:[%s4132_s0] sm:$0xff]  ;;  %v125_v7 = vld [vmem:[%s4132_s0 + $0x10] sm:$0xff] }
  0x6a   :  { %1750 = vmatpush1.bf16.msra.mxu1 %v3243_v31  ;;  %1710 = vmatprep.subr.bf16.mxu0 %v3244_v32  ;;  %v3286_v5 = vld [vmem:[#allocation5 + $0x104] ss:$16 sps:$4 sm:$0xff]   ;;  %v3290_v10 = vld [vmem:[#allocation5 + $0x100] ss:$16 sps:$4 sm:$0xff]  }
  0x6b   :  { %1751 = vmatprep.subr.bf16.mxu1 %v3246_v33  ;;  %v131_v6 = vld [vmem:[%s4133_s1] sm:$0xff]  ;;  %v133_v8 = vld [vmem:[%s4133_s1 + $0x10] sm:$0xff] }
  0x6c   :  { %v3288_v9 = vld [vmem:[#allocation5 + $0x304] ss:$16 sps:$4 sm:$0xff]   ;;  %v3291_v11 = vld [vmem:[#allocation5 + $0x300] ss:$16 sps:$4 sm:$0xff]   ;;  %v139_v12 = vmul.f32 %v131_v6, %v123_v4  ;;  %v141_v13 = vmul.f32 %v133_v8, %v125_v7 }
  0x6d   :  { %1711 = vmatpush2.bf16.msra.mxu0 %v3248_v34  ;;  %v3294_v14 = vld [vmem:[#allocation5 + $0x4e4] ss:$16 sps:$4 sm:$0xff]   ;;  %v3292_v18 = vld [vmem:[#allocation5 + $0x4e0] ss:$16 sps:$4 sm:$0xff]  }
  0x6e   :  { %1752 = vmatpush2.bf16.msra.mxu1 %v3249_v35  ;;  %1712 = vmatprep.subr.bf16.mxu0 %v3250_v36  ;;  %v3297_v15 = vld [vmem:[#allocation5 + $0x6e4] ss:$16 sps:$4 sm:$0xff]   ;;  %v3974_v16 = vpack.c.bf16 %v139_v12, %v139_v12  ;;  %v3976_v17 = vpack.c.bf16 %v141_v13, %v141_v13  ;;  %v3295_v19 = vld [vmem:[#allocation5 + $0x6e0] ss:$16 sps:$4 sm:$0xff]  }
  0x6f   :  { %1753 = vmatprep.subr.bf16.mxu1 %v3252_v37  ;;  %v3300_v20 = vld [vmem:[#allocation5 + $0x4c4] ss:$16 sps:$4 sm:$0xff]   ;;  %v3298_v22 = vld [vmem:[#allocation5 + $0x4c0] ss:$16 sps:$4 sm:$0xff]  }
  0x70   :  { %v3303_v21 = vld [vmem:[#allocation5 + $0x6c4] ss:$16 sps:$4 sm:$0xff]   ;;  %v3301_v23 = vld [vmem:[#allocation5 + $0x6c0] ss:$16 sps:$4 sm:$0xff]  }
  0x71   :  { %1713 = vmatpush2.bf16.msra.mxu0 %v3254_v38  ;;  %v3306_v24 = vld [vmem:[#allocation5 + $0x4a4] ss:$16 sps:$4 sm:$0xff]   ;;  %v3304_v26 = vld [vmem:[#allocation5 + $0x4a0] ss:$16 sps:$4 sm:$0xff]  }
  0x72   :  { %1754 = vmatpush2.bf16.msra.mxu1 %v3255_v39  ;;  %1714 = vmatprep.subr.bf16.mxu0 %v3256_v40  ;;  %v3309_v25 = vld [vmem:[#allocation5 + $0x6a4] ss:$16 sps:$4 sm:$0xff]   ;;  %v3307_v27 = vld [vmem:[#allocation5 + $0x6a0] ss:$16 sps:$4 sm:$0xff]  }
  0x73   :  { %1755 = vmatprep.subr.bf16.mxu1 %v3258_v41  ;;  %v3312_v28 = vld [vmem:[#allocation5 + $0x484] ss:$16 sps:$4 sm:$0xff]   ;;  %v3310_v30 = vld [vmem:[#allocation5 + $0x480] ss:$16 sps:$4 sm:$0xff]   ;;  %v130_v41 = vld [vmem:[%s4132_s0 + $0x38] sm:$0xff] }
  0x74   :  { %v3315_v29 = vld [vmem:[#allocation5 + $0x684] ss:$16 sps:$4 sm:$0xff]   ;;  %v3313_v31 = vld [vmem:[#allocation5 + $0x680] ss:$16 sps:$4 sm:$0xff]  }
  0x75   :  { %1715 = vmatpush2.bf16.msra.mxu0 %v3260_v42  ;;  %v3318_v32 = vld [vmem:[#allocation5 + $0x464] ss:$16 sps:$4 sm:$0xff]   ;;  %v3316_v34 = vld [vmem:[#allocation5 + $0x460] ss:$16 sps:$4 sm:$0xff]   ;;  %v138_v42 = vld [vmem:[%s4133_s1 + $0x38] sm:$0xff] }
  0x76   :  { %1756 = vmatpush2.bf16.msra.mxu1 %v3261_v43  ;;  %1716 = vmatprep.subr.bf16.mxu0 %v3262_v44  ;;  %v3321_v33 = vld [vmem:[#allocation5 + $0x664] ss:$16 sps:$4 sm:$0xff]   ;;  %v3319_v35 = vld [vmem:[#allocation5 + $0x660] ss:$16 sps:$4 sm:$0xff]   ;;  %v146_v44 = vmul.f32 %v138_v42, %v130_v41  ;;  %v3390_v41 = vld [vmem:[#allocation5 + $0x2e8] ss:$16 sps:$4 sm:$0xff]  }
  0x77   :  { %1757 = vmatprep.subr.bf16.mxu1 %v3264_v45  ;;  %v3324_v36 = vld [vmem:[#allocation5 + $0x444] ss:$16 sps:$4 sm:$0xff]   ;;  %v3322_v38 = vld [vmem:[#allocation5 + $0x440] ss:$16 sps:$4 sm:$0xff]   ;;  %v3395_v42 = vld [vmem:[#allocation5 + $0xac] ss:$16 sps:$4 sm:$0xff]  }
  0x78   :  { %v3327_v37 = vld [vmem:[#allocation5 + $0x644] ss:$16 sps:$4 sm:$0xff]   ;;  %v3325_v39 = vld [vmem:[#allocation5 + $0x640] ss:$16 sps:$4 sm:$0xff]   ;;  %v3986_v46 = vpack.c.bf16 %v146_v44, %v146_v44  ;;  %v3393_v44 = vld [vmem:[#allocation5 + $0xa8] ss:$16 sps:$4 sm:$0xff]  }
  0x79   :  { %1717 = vmatpush2.bf16.msra.mxu0 %v3266_v50  ;;  %v3330_v40 = vld [vmem:[#allocation5 + $0x424] ss:$16 sps:$4 sm:$0xff]   ;;  %v3328_v45 = vld [vmem:[#allocation5 + $0x420] ss:$16 sps:$4 sm:$0xff]  }
  0x7a   :  { %1758 = vmatpush2.bf16.msra.mxu1 %v3267_v51  ;;  %1718 = vmatprep.subr.bf16.mxu0 %v3268_v52  ;;  %v3333_v43 = vld [vmem:[#allocation5 + $0x624] ss:$16 sps:$4 sm:$0xff]   ;;  %v3331_v47 = vld [vmem:[#allocation5 + $0x620] ss:$16 sps:$4 sm:$0xff]   ;;  %v144_v52 = vmul.f32 %v136_v49, %v128_v48  ;;  %v3404_v48 = vld [vmem:[#allocation5 + $0x2ac] ss:$16 sps:$4 sm:$0xff]  }
  0x7b   :  { %1759 = vmatprep.subr.bf16.mxu1 %v3270_v55  ;;  %v3336_v50 = vld [vmem:[#allocation5 + $0x404] ss:$16 sps:$4 sm:$0xff]   ;;  %v3334_v54 = vld [vmem:[#allocation5 + $0x400] ss:$16 sps:$4 sm:$0xff]   ;;  %v3399_v49 = vld [vmem:[#allocation5 + $0x88] ss:$16 sps:$4 sm:$0xff]  }
  0x7c   :  { %v3339_v51 = vld [vmem:[#allocation5 + $0x604] ss:$16 sps:$4 sm:$0xff]   ;;  %v3996_v55 = vpack.c.bf16 %v144_v52, %v144_v52  ;;  %v3351_v6 = vld [vmem:[#allocation5 + $0x5a0] ss:$16 sps:$4 sm:$0xff]   ;;  %v3405_v52 = vld [vmem:[#allocation5 + $0x68] ss:$16 sps:$4 sm:$0xff]  }
  0x7d   :  { %1719 = vmatpush2.bf16.msra.mxu0 %v3272_v58  ;;  %v403_v53 = vld [vmem:[#allocation5 + $0x7c0] sm:$0xff] }
  0x7e   :  { %1760 = vmatpush2.bf16.msra.mxu1 %v3273_v59  ;;  %1720 = vmatprep.subr.bf16.mxu0 %v3274_v60  ;;  %v3337_v58 = vld [vmem:[#allocation5 + $0x600] ss:$16 sps:$4 sm:$0xff]   ;;  %v3342_v59 = vld [vmem:[#allocation5 + $0x5e4] ss:$16 sps:$4 sm:$0xff]   ;;  %v3073_v60 = vcombine.high %v403_v53, %v403_v53 }
  0x7f   :  { %1761 = vmatprep.subr.bf16.mxu1 %v3276_v61  ;;  %v3072_v61 = vcombine.low %v403_v53, %v403_v53  ;;  %v3353_v4 = vld [vmem:[#allocation5 + $0x5a4] ss:$16 sps:$4 sm:$0xff]   ;;  %v3354_v7 = vld [vmem:[#allocation5 + $0x780] ss:$16 sps:$4 sm:$0xff]   ;;  %v3408_v53 = vld [vmem:[#allocation5 + $0x288] ss:$16 sps:$4 sm:$0xff]  }
  0x80   :  { %v3359_v8 = vld [vmem:[#allocation5 + $0x584] ss:$16 sps:$4 sm:$0xff]  }
  0x81   :  { %1721 = vmatpush2.bf16.msra.mxu0 %v3278_v62  ;;  %v3340_v62 = vld [vmem:[#allocation5 + $0x5e0] ss:$16 sps:$4 sm:$0xff]   ;;  %v3365_v12 = vld [vmem:[#allocation5 + $0x564] ss:$16 sps:$4 sm:$0xff]  }
  0x82   :  { %1762 = vmatpush2.bf16.msra.mxu1 %v3279_v63  ;;  %1722 = vmatprep.subr.bf16.mxu0 %v3280_v0  ;;  %v1683_v63 = vsel %vm1681_vm1, %v3072_v61, 0  ;;  %v3347_v0 = vld [vmem:[#allocation5 + $0x5c4] ss:$16 sps:$4 sm:$0xff]   ;;  %v3422_v61 = vld [vmem:[#allocation5 + $0x24c] ss:$16 sps:$4 sm:$0xff]  }
  0x83   :  { %1763 = vmatprep.subr.bf16.mxu1 %v3282_v1  ;;  %v3350_v1 = vld [vmem:[#allocation5 + $0x7a4] ss:$16 sps:$4 sm:$0xff]  }
  0x84   :  { %v3368_v13 = vld [vmem:[#allocation5 + $0x744] ss:$16 sps:$4 sm:$0xff]  }
  0x85   :  { %1723 = vmatpush2.bf16.msra.mxu0 %v3284_v2  ;;  %v3345_v2 = vld [vmem:[#allocation5 + $0x5c0] ss:$16 sps:$4 sm:$0xff]  }
  0x86   :  { %1764 = vmatpush2.bf16.msra.mxu1 %v3285_v3  ;;  %1724 = vmatprep.subr.bf16.mxu0 %v3286_v5  ;;  %v3348_v3 = vld [vmem:[#allocation5 + $0x7a0] ss:$16 sps:$4 sm:$0xff]   ;;  %v3356_v5 = vld [vmem:[#allocation5 + $0x784] ss:$16 sps:$4 sm:$0xff]  }
  0x87   :  { %1765 = vmatprep.subr.bf16.mxu1 %v3288_v9  ;;  %v3362_v9 = vld [vmem:[#allocation5 + $0x764] ss:$16 sps:$4 sm:$0xff]  }
  0x89   :  { %1725 = vmatpush2.bf16.msra.mxu0 %v3290_v10  ;;  %v3357_v10 = vld [vmem:[#allocation5 + $0x580] ss:$16 sps:$4 sm:$0xff]  }
  0x8a   :  { %1766 = vmatpush2.bf16.msra.mxu1 %v3291_v11  ;;  %1776 = vmatprep.subr.bf16.mxu0 %v3294_v14  ;;  %v3360_v11 = vld [vmem:[#allocation5 + $0x760] ss:$16 sps:$4 sm:$0xff]  }
  0x8b   :  { %1817 = vmatprep.subr.bf16.mxu1 %v3297_v15  ;;  %v3363_v14 = vld [vmem:[#allocation5 + $0x560] ss:$16 sps:$4 sm:$0xff]  }
  0x8c   :  { %1727 = vmatmul.mubr.bf16.vlgmr.msra.gmra.mxu0 %v3974_v16  ;;  %v3366_v15 = vld [vmem:[#allocation5 + $0x740] ss:$16 sps:$4 sm:$0xff]  }
  0x8d   :  { %1768 = vmatmul.mubr.bf16.vlgmr.msra.gmra.mxu1 %v3976_v17  ;;  %1777 = vmatpush1.bf16.msra.mxu0 %v3292_v18  ;;  %v3371_v18 = vld [vmem:[#allocation5 + $0x544] ss:$16 sps:$4 sm:$0xff]  }
  0x8e   :  { %1818 = vmatpush1.bf16.msra.mxu1 %v3295_v19  ;;  %1778 = vmatprep.subr.bf16.mxu0 %v3300_v20  ;;  %v3374_v19 = vld [vmem:[#allocation5 + $0x724] ss:$16 sps:$4 sm:$0xff]   ;;  %v3369_v20 = vld [vmem:[#allocation5 + $0x540] ss:$16 sps:$4 sm:$0xff]  }
  0x8f   :  { %1819 = vmatprep.subr.bf16.mxu1 %v3303_v21  ;;  %3077 = vmatprep.mubr.msk.bf16.mxu1 %vm1677_vm0, %v3986_v46  ;;  %v3372_v21 = vld [vmem:[#allocation5 + $0x720] ss:$16 sps:$4 sm:$0xff]  }
  0x90   :  { %1808 = vmatprep.mubr.bf16.mxu0 %v3996_v55 }
  0x91   :  { %1779 = vmatpush1.bf16.msra.mxu0 %v3298_v22  ;;  %v129_v22 = vld [vmem:[%s4132_s0 + $0x30] sm:$0xff] }
  0x92   :  { %1820 = vmatpush1.bf16.msra.mxu1 %v3301_v23  ;;  %1780 = vmatprep.subr.bf16.mxu0 %v3306_v24  ;;  %v137_v23 = vld [vmem:[%s4133_s1 + $0x30] sm:$0xff] }
  0x93   :  { %1821 = vmatprep.subr.bf16.mxu1 %v3309_v25  ;;  %v3377_v24 = vld [vmem:[#allocation5 + $0x524] ss:$16 sps:$4 sm:$0xff]  }
  0x94   :  { %v3380_v25 = vld [vmem:[#allocation5 + $0x704] ss:$16 sps:$4 sm:$0xff]  }
  0x95   :  { %1781 = vmatpush1.bf16.msra.mxu0 %v3304_v26  ;;  %v3375_v26 = vld [vmem:[#allocation5 + $0x520] ss:$16 sps:$4 sm:$0xff]  }
  0x96   :  { %1822 = vmatpush1.bf16.msra.mxu1 %v3307_v27  ;;  %1782 = vmatprep.subr.bf16.mxu0 %v3312_v28  ;;  %v3378_v27 = vld [vmem:[#allocation5 + $0x700] ss:$16 sps:$4 sm:$0xff]   ;;  %v145_v28 = vmul.f32 %v137_v23, %v129_v22  ;;  %v3455_v22 = vld [vmem:[#allocation5 + $0x16c] ss:$16 sps:$4 sm:$0xff]  }
  0x97   :  { %1823 = vmatprep.subr.bf16.mxu1 %v3315_v29  ;;  %v127_v29 = vld [vmem:[%s4132_s0 + $0x20] sm:$0xff]  ;;  %v3458_v23 = vld [vmem:[#allocation5 + $0x38c] ss:$16 sps:$4 sm:$0xff]  }
  0x99   :  { %1783 = vmatpush1.bf16.msra.mxu0 %v3310_v30  ;;  %v135_v30 = vld [vmem:[%s4133_s1 + $0x20] sm:$0xff] }
  0x9a   :  { %1824 = vmatpush1.bf16.msra.mxu1 %v3313_v31  ;;  %1784 = vmatprep.subr.bf16.mxu0 %v3318_v32  ;;  %v3383_v31 = vld [vmem:[#allocation5 + $0x504] ss:$16 sps:$4 sm:$0xff]   ;;  %v3386_v32 = vld [vmem:[#allocation5 + $0xec] ss:$16 sps:$4 sm:$0xff]  }
  0x9b   :  { %1825 = vmatprep.subr.bf16.mxu1 %v3321_v33  ;;  %v3381_v33 = vld [vmem:[#allocation5 + $0x500] ss:$16 sps:$4 sm:$0xff]  }
  0x9d   :  { %1785 = vmatpush1.bf16.msra.mxu0 %v3316_v34  ;;  %v4013_v34 = vpack.c.bf16 %v145_v28, %v145_v28  ;;  %v3459_v28 = vld [vmem:[#allocation5 + $0x148] ss:$16 sps:$4 sm:$0xff]  }
  0x9e   :  { %1826 = vmatpush1.bf16.msra.mxu1 %v3319_v35  ;;  %1786 = vmatprep.subr.bf16.mxu0 %v3324_v36  ;;  %v143_v35 = vmul.f32 %v135_v30, %v127_v29  ;;  %v3384_v36 = vld [vmem:[#allocation5 + $0xe8] ss:$16 sps:$4 sm:$0xff]   ;;  %v3467_v30 = vld [vmem:[#allocation5 + $0x12c] ss:$16 sps:$4 sm:$0xff]  }
  0x9f   :  { %1827 = vmatprep.subr.bf16.mxu1 %v3327_v37  ;;  %v3389_v37 = vld [vmem:[#allocation5 + $0xcc] ss:$16 sps:$4 sm:$0xff]   ;;  %v3462_v29 = vld [vmem:[#allocation5 + $0x368] ss:$16 sps:$4 sm:$0xff]  }
  0xa1   :  { %1787 = vmatpush1.bf16.msra.mxu0 %v3322_v38  ;;  %v3392_v38 = vld [vmem:[#allocation5 + $0x2ec] ss:$16 sps:$4 sm:$0xff]  }
  0xa2   :  { %1828 = vmatpush1.bf16.msra.mxu1 %v3325_v39  ;;  %1788 = vmatprep.subr.bf16.mxu0 %v3330_v40  ;;  %v4016_v39 = vpack.c.bf16 %v143_v35, %v143_v35  ;;  %v3387_v40 = vld [vmem:[#allocation5 + $0xc8] ss:$16 sps:$4 sm:$0xff]   ;;  %v3473_v35 = vld [vmem:[#allocation5 + $0x10c] ss:$16 sps:$4 sm:$0xff]  }
  0xa3   :  { %1829 = vmatprep.subr.bf16.mxu1 %v3333_v43  ;;  %v3398_v43 = vld [vmem:[#allocation5 + $0x2cc] ss:$16 sps:$4 sm:$0xff]  }
  0xa5   :  { %1789 = vmatpush1.bf16.msra.mxu0 %v3328_v45  ;;  %v3396_v45 = vld [vmem:[#allocation5 + $0x2c8] ss:$16 sps:$4 sm:$0xff]  }
  0xa6   :  { %1830 = vmatpush1.bf16.msra.mxu1 %v3331_v47  ;;  %1790 = vmatprep.subr.bf16.mxu0 %v3336_v50  ;;  %v3401_v47 = vld [vmem:[#allocation5 + $0x8c] ss:$16 sps:$4 sm:$0xff]   ;;  %v3402_v50 = vld [vmem:[#allocation5 + $0x2a8] ss:$16 sps:$4 sm:$0xff]  }
  0xa7   :  { %1831 = vmatprep.subr.bf16.mxu1 %v3339_v51  ;;  %v3407_v51 = vld [vmem:[#allocation5 + $0x6c] ss:$16 sps:$4 sm:$0xff]  }
  0xa9   :  { %1791 = vmatpush1.bf16.msra.mxu0 %v3334_v54  ;;  %v3413_v54 = vld [vmem:[#allocation5 + $0x4c] ss:$16 sps:$4 sm:$0xff]  }
  0xaa   :  { %1832 = vmatpush1.bf16.msra.mxu1 %v3337_v58  ;;  %1792 = vmatprep.subr.bf16.mxu0 %v3342_v59  ;;  %v3416_v58 = vld [vmem:[#allocation5 + $0x26c] ss:$16 sps:$4 sm:$0xff]   ;;  %v3411_v59 = vld [vmem:[#allocation5 + $0x48] ss:$16 sps:$4 sm:$0xff]  }
  0xab   :  { %3076 = vmatprep.subr.msk.bf16.mxu1 %vm1681_vm1, %v3073_v60  ;;  %v3419_v60 = vld [vmem:[#allocation5 + $0x2c] ss:$16 sps:$4 sm:$0xff]  }
  0xad   :  { %1793 = vmatpush2.bf16.msra.mxu0 %v3340_v62  ;;  %v3417_v62 = vld [vmem:[#allocation5 + $0x28] ss:$16 sps:$4 sm:$0xff]  }
  0xae   :  { %1836 = vmatpush2.bf16.msra.mxu1 %v1683_v63  ;;  %1794 = vmatprep.subr.bf16.mxu0 %v3347_v0  ;;  %v3420_v63 = vld [vmem:[#allocation5 + $0x248] ss:$16 sps:$4 sm:$0xff]   ;;  %v3425_v0 = vld [vmem:[#allocation5 + $0xc] ss:$16 sps:$4 sm:$0xff]  }
  0xaf   :  { %1837 = vmatprep.subr.bf16.mxu1 %v3350_v1  ;;  %v3428_v1 = vld [vmem:[#allocation5 + $0x22c] ss:$16 sps:$4 sm:$0xff]  }
  0xb1   :  { %1795 = vmatpush2.bf16.msra.mxu0 %v3345_v2  ;;  %v3423_v2 = vld [vmem:[#allocation5 + $0x8] ss:$16 sps:$4 sm:$0xff]  }
  0xb2   :  { %1838 = vmatpush2.bf16.msra.mxu1 %v3348_v3  ;;  %1796 = vmatprep.subr.bf16.mxu0 %v3353_v4  ;;  %v3426_v3 = vld [vmem:[#allocation5 + $0x228] ss:$16 sps:$4 sm:$0xff]   ;;  %v3431_v4 = vld [vmem:[#allocation5 + $0x1ec] ss:$16 sps:$4 sm:$0xff]  }
  0xb3   :  { %1839 = vmatprep.subr.bf16.mxu1 %v3356_v5  ;;  %v3434_v5 = vld [vmem:[#allocation5 + $0x20c] ss:$16 sps:$4 sm:$0xff]  }
  0xb5   :  { %1797 = vmatpush2.bf16.msra.mxu0 %v3351_v6  ;;  %v3429_v6 = vld [vmem:[#allocation5 + $0x1e8] ss:$16 sps:$4 sm:$0xff]  }
  0xb6   :  { %1840 = vmatpush2.bf16.msra.mxu1 %v3354_v7  ;;  %1798 = vmatprep.subr.bf16.mxu0 %v3359_v8  ;;  %v3432_v7 = vld [vmem:[#allocation5 + $0x208] ss:$16 sps:$4 sm:$0xff]   ;;  %v3437_v8 = vld [vmem:[#allocation5 + $0x1cc] ss:$16 sps:$4 sm:$0xff]  }
  0xb7   :  { %1841 = vmatprep.subr.bf16.mxu1 %v3362_v9  ;;  %v3440_v9 = vld [vmem:[#allocation5 + $0x3ec] ss:$16 sps:$4 sm:$0xff]  }
  0xb9   :  { %1799 = vmatpush2.bf16.msra.mxu0 %v3357_v10  ;;  %v3435_v10 = vld [vmem:[#allocation5 + $0x1c8] ss:$16 sps:$4 sm:$0xff]  }
  0xba   :  { %1842 = vmatpush2.bf16.msra.mxu1 %v3360_v11  ;;  %1800 = vmatprep.subr.bf16.mxu0 %v3365_v12  ;;  %v3438_v11 = vld [vmem:[#allocation5 + $0x3e8] ss:$16 sps:$4 sm:$0xff]   ;;  %v3443_v12 = vld [vmem:[#allocation5 + $0x1ac] ss:$16 sps:$4 sm:$0xff]  }
  0xbb   :  { %1843 = vmatprep.subr.bf16.mxu1 %v3368_v13  ;;  %v3446_v13 = vld [vmem:[#allocation5 + $0x3cc] ss:$16 sps:$4 sm:$0xff]  }
  0xbd   :  { %1801 = vmatpush2.bf16.msra.mxu0 %v3363_v14  ;;  %v3441_v14 = vld [vmem:[#allocation5 + $0x1a8] ss:$16 sps:$4 sm:$0xff]  }
  0xbe   :  { %1844 = vmatpush2.bf16.msra.mxu1 %v3366_v15  ;;  %1802 = vmatprep.subr.bf16.mxu0 %v3371_v18  ;;  %v3444_v15 = vld [vmem:[#allocation5 + $0x3c8] ss:$16 sps:$4 sm:$0xff]   ;;  %v3449_v18 = vld [vmem:[#allocation5 + $0x18c] ss:$16 sps:$4 sm:$0xff]  }
  0xbf   :  { %1845 = vmatprep.subr.bf16.mxu1 %v3374_v19  ;;  %v3452_v19 = vld [vmem:[#allocation5 + $0x3ac] ss:$16 sps:$4 sm:$0xff]  }
  0xc1   :  { %1803 = vmatpush2.bf16.msra.mxu0 %v3369_v20  ;;  %v3447_v20 = vld [vmem:[#allocation5 + $0x188] ss:$16 sps:$4 sm:$0xff]  }
  0xc2   :  { %1846 = vmatpush2.bf16.msra.mxu1 %v3372_v21  ;;  %1804 = vmatprep.subr.bf16.mxu0 %v3377_v24  ;;  %v3450_v21 = vld [vmem:[#allocation5 + $0x3a8] ss:$16 sps:$4 sm:$0xff]  }
  0xc3   :  { %1847 = vmatprep.subr.bf16.mxu1 %v3380_v25  ;;  %v3453_v24 = vld [vmem:[#allocation5 + $0x168] ss:$16 sps:$4 sm:$0xff]  }
  0xc4   :  { %v3456_v25 = vld [vmem:[#allocation5 + $0x388] ss:$16 sps:$4 sm:$0xff]  }
  0xc5   :  { %1805 = vmatpush2.bf16.msra.mxu0 %v3375_v26  ;;  %v3461_v26 = vld [vmem:[#allocation5 + $0x14c] ss:$16 sps:$4 sm:$0xff]  }
  0xc6   :  { %1848 = vmatpush2.bf16.msra.mxu1 %v3378_v27  ;;  %1806 = vmatprep.subr.bf16.mxu0 %v3383_v31  ;;  %v3464_v27 = vld [vmem:[#allocation5 + $0x36c] ss:$16 sps:$4 sm:$0xff]  }
  0xc7   :  { %1858 = vmatprep.subr.bf16.mxu1 %v3386_v32  ;;  %v3470_v31 = vld [vmem:[#allocation5 + $0x34c] ss:$16 sps:$4 sm:$0xff]   ;;  %v3465_v32 = vld [vmem:[#allocation5 + $0x128] ss:$16 sps:$4 sm:$0xff]  }
  0xc9   :  { %1850 = vmatmul.mubr.bf16.vlgmr.msra.gmra.mxu1 %v4013_v34  ;;  %1807 = vmatpush2.bf16.msra.mxu0 %v3381_v33  ;;  %v3468_v33 = vld [vmem:[#allocation5 + $0x348] ss:$16 sps:$4 sm:$0xff]  }
  0xca   :  { %1859 = vmatpush1.bf16.msra.mxu1 %v3384_v36  ;;  %1899 = vmatprep.subr.bf16.mxu0 %v3392_v38  ;;  %v3476_v36 = vld [vmem:[#allocation5 + $0x32c] ss:$16 sps:$4 sm:$0xff]   ;;  %v3474_v38 = vld [vmem:[#allocation5 + $0x328] ss:$16 sps:$4 sm:$0xff]  }
  0xcb   :  { %1860 = vmatprep.subr.bf16.mxu1 %v3389_v37  ;;  %1890 = vmatprep.mubr.bf16.mxu1 %v3956_v56  ;;  %v3410_v56 = vld [vmem:[#allocation5 + $0x28c] ss:$16 sps:$4 sm:$0xff]   ;;  %v3471_v37 = vld [vmem:[#allocation5 + $0x108] ss:$16 sps:$4 sm:$0xff]  }
  0xcc   :  { %1809 = vmatmul.mubr.bf16.vlgmr.msra.gmra.mxu0 %v4016_v39 }
  0xcd   :  { %1900 = vmatpush1.bf16.msra.mxu0 %v3390_v41  ;;  %1931 = vmatprep.mubr.bf16.mxu0 %v3958_v57  ;;  %v3414_v57 = vld [vmem:[#allocation5 + $0x268] ss:$16 sps:$4 sm:$0xff]   ;;  %v3482_v41 = vld [vmem:[#allocation5 + $0x4ec] ss:$16 sps:$4 sm:$0xff]  }
  0xce   :  { %1861 = vmatpush1.bf16.msra.mxu1 %v3387_v40  ;;  %1901 = vmatprep.subr.bf16.mxu0 %v3398_v43  ;;  %v3479_v40 = vld [vmem:[#allocation5 + $0x30c] ss:$16 sps:$4 sm:$0xff]   ;;  %v3480_v43 = vld [vmem:[#allocation5 + $0x4e8] ss:$16 sps:$4 sm:$0xff]  }
  0xcf   :  { %1862 = vmatprep.subr.bf16.mxu1 %v3395_v42  ;;  %v3477_v42 = vld [vmem:[#allocation5 + $0x308] ss:$16 sps:$4 sm:$0xff]  }
  0xd1   :  { %1902 = vmatpush1.bf16.msra.mxu0 %v3396_v45  ;;  %v3488_v45 = vld [vmem:[#allocation5 + $0x6ec] ss:$16 sps:$4 sm:$0xff]  }
  0xd2   :  { %1863 = vmatpush1.bf16.msra.mxu1 %v3393_v44  ;;  %1903 = vmatprep.subr.bf16.mxu0 %v3404_v48  ;;  %v3485_v44 = vld [vmem:[#allocation5 + $0x4cc] ss:$16 sps:$4 sm:$0xff]   ;;  %v3486_v48 = vld [vmem:[#allocation5 + $0x6e8] ss:$16 sps:$4 sm:$0xff]  }
  0xd3   :  { %1864 = vmatprep.subr.bf16.mxu1 %v3401_v47  ;;  %v3483_v47 = vld [vmem:[#allocation5 + $0x4c8] ss:$16 sps:$4 sm:$0xff]  }
  0xd5   :  { %1904 = vmatpush1.bf16.msra.mxu0 %v3402_v50  ;;  %v3494_v50 = vld [vmem:[#allocation5 + $0x6cc] ss:$16 sps:$4 sm:$0xff]  }
  0xd6   :  { %1865 = vmatpush1.bf16.msra.mxu1 %v3399_v49  ;;  %1905 = vmatprep.subr.bf16.mxu0 %v3410_v56  ;;  %v3491_v49 = vld [vmem:[#allocation5 + $0x4ac] ss:$16 sps:$4 sm:$0xff]   ;;  %v3492_v56 = vld [vmem:[#allocation5 + $0x6c8] ss:$16 sps:$4 sm:$0xff]  }
  0xd7   :  { %1866 = vmatprep.subr.bf16.mxu1 %v3407_v51  ;;  %v3489_v51 = vld [vmem:[#allocation5 + $0x4a8] ss:$16 sps:$4 sm:$0xff]  }
  0xd9   :  { %1906 = vmatpush1.bf16.msra.mxu0 %v3408_v53  ;;  %v3500_v53 = vld [vmem:[#allocation5 + $0x6ac] ss:$16 sps:$4 sm:$0xff]  }
  0xda   :  { %1867 = vmatpush1.bf16.msra.mxu1 %v3405_v52  ;;  %1907 = vmatprep.subr.bf16.mxu0 %v3416_v58  ;;  %v3497_v52 = vld [vmem:[#allocation5 + $0x48c] ss:$16 sps:$4 sm:$0xff]  }
  0xdb   :  { %1868 = vmatprep.subr.bf16.mxu1 %v3413_v54  ;;  %v3495_v54 = vld [vmem:[#allocation5 + $0x488] ss:$16 sps:$4 sm:$0xff]   ;;  %v3503_v58 = vld [vmem:[#allocation5 + $0x46c] ss:$16 sps:$4 sm:$0xff]  }
  0xdd   :  { %1908 = vmatpush1.bf16.msra.mxu0 %v3414_v57  ;;  %v3504_v57 = vld [vmem:[#allocation5 + $0x688] ss:$16 sps:$4 sm:$0xff]  }
  0xde   :  { %1869 = vmatpush1.bf16.msra.mxu1 %v3411_v59  ;;  %1909 = vmatprep.subr.bf16.mxu0 %v3422_v61  ;;  %v3506_v59 = vld [vmem:[#allocation5 + $0x68c] ss:$16 sps:$4 sm:$0xff]   ;;  %v3507_v61 = vld [vmem:[#allocation5 + $0x448] ss:$16 sps:$4 sm:$0xff]  }
  0xdf   :  { %1870 = vmatprep.subr.bf16.mxu1 %v3419_v60  ;;  %v3512_v60 = vld [vmem:[#allocation5 + $0x66c] ss:$16 sps:$4 sm:$0xff]  }
  0xe1   :  { %1910 = vmatpush1.bf16.msra.mxu0 %v3420_v63  ;;  %v3515_v63 = vld [vmem:[#allocation5 + $0x42c] ss:$16 sps:$4 sm:$0xff]  }
  0xe2   :  { %1871 = vmatpush1.bf16.msra.mxu1 %v3417_v62  ;;  %1911 = vmatprep.subr.bf16.mxu0 %v3428_v1  ;;  %v3510_v62 = vld [vmem:[#allocation5 + $0x668] ss:$16 sps:$4 sm:$0xff]  }
  0xe3   :  { %1872 = vmatprep.subr.bf16.mxu1 %v3425_v0  ;;  %v3513_v0 = vld [vmem:[#allocation5 + $0x428] ss:$16 sps:$4 sm:$0xff]  }
  0xe4   :  { %v3516_v1 = vld [vmem:[#allocation5 + $0x648] ss:$16 sps:$4 sm:$0xff]  }
  0xe5   :  { %1912 = vmatpush1.bf16.msra.mxu0 %v3426_v3  ;;  %v3524_v3 = vld [vmem:[#allocation5 + $0x62c] ss:$16 sps:$4 sm:$0xff]  }
  0xe6   :  { %1873 = vmatpush1.bf16.msra.mxu1 %v3423_v2  ;;  %1913 = vmatprep.subr.bf16.mxu0 %v3434_v5  ;;  %v3521_v2 = vld [vmem:[#allocation5 + $0x40c] ss:$16 sps:$4 sm:$0xff]   ;;  %v3522_v5 = vld [vmem:[#allocation5 + $0x628] ss:$16 sps:$4 sm:$0xff]  }
  0xe7   :  { %1874 = vmatprep.subr.bf16.mxu1 %v3431_v4  ;;  %v3519_v4 = vld [vmem:[#allocation5 + $0x408] ss:$16 sps:$4 sm:$0xff]  }
  0xe9   :  { %1914 = vmatpush1.bf16.msra.mxu0 %v3432_v7  ;;  %v3530_v7 = vld [vmem:[#allocation5 + $0x60c] ss:$16 sps:$4 sm:$0xff]  }
  0xea   :  { %1875 = vmatpush2.bf16.msra.mxu1 %v3429_v6  ;;  %1915 = vmatprep.subr.bf16.mxu0 %v3440_v9  ;;  %v3527_v6 = vld [vmem:[#allocation5 + $0x5ec] ss:$16 sps:$4 sm:$0xff]   ;;  %v3525_v9 = vld [vmem:[#allocation5 + $0x5e8] ss:$16 sps:$4 sm:$0xff]  }
  0xeb   :  { %1876 = vmatprep.subr.bf16.mxu1 %v3437_v8  ;;  %v404_v8 = vld [vmem:[#allocation5 + $0x7c8] sm:$0xff] }
  0xed   :  { %1916 = vmatpush2.bf16.msra.mxu0 %v3438_v11  ;;  %v3533_v11 = vld [vmem:[#allocation5 + $0x5cc] ss:$16 sps:$4 sm:$0xff]  }
  0xee   :  { %1877 = vmatpush2.bf16.msra.mxu1 %v3435_v10  ;;  %1917 = vmatprep.subr.bf16.mxu0 %v3446_v13  ;;  %v3528_v10 = vld [vmem:[#allocation5 + $0x608] ss:$16 sps:$4 sm:$0xff]   ;;  %v3074_v13 = vcombine.low %v404_v8, %v404_v8 }
  0xef   :  { %1878 = vmatprep.subr.bf16.mxu1 %v3443_v12  ;;  %v3075_v12 = vcombine.high %v404_v8, %v404_v8  ;;  %v3593_v8 = vld [vmem:[#allocation8] ss:$8 sps:$4 sm:$0xff]  }
  0xf1   :  { %1918 = vmatpush2.bf16.msra.mxu0 %v3444_v15  ;;  %v1689_v15 = vsel %vm1681_vm1, %v3074_v13, 0  ;;  %v3635_v13 = vld [vmem:[#allocation8 + $0x120] ss:$8 sps:$4 sm:$0xff]  }
  0xf2   :  { %1879 = vmatpush2.bf16.msra.mxu1 %v3441_v14  ;;  %1919 = vmatprep.subr.bf16.mxu0 %v3452_v19  ;;  %v3531_v14 = vld [vmem:[#allocation5 + $0x5c8] ss:$16 sps:$4 sm:$0xff]   ;;  %v3541_v19 = vld [vmem:[#allocation5 + $0x7ac] ss:$16 sps:$4 sm:$0xff]  }
  0xf3   :  { %1880 = vmatprep.subr.bf16.mxu1 %v3449_v18  ;;  %v3538_v18 = vld [vmem:[#allocation5 + $0x5ac] ss:$16 sps:$4 sm:$0xff]  }
  0xf5   :  { %1920 = vmatpush2.bf16.msra.mxu0 %v3450_v21  ;;  %v3539_v21 = vld [vmem:[#allocation5 + $0x7a8] ss:$16 sps:$4 sm:$0xff]  }
  0xf6   :  { %1881 = vmatpush2.bf16.msra.mxu1 %v3447_v20  ;;  %1921 = vmatprep.subr.bf16.mxu0 %v3458_v23  ;;  %v3536_v20 = vld [vmem:[#allocation5 + $0x5a8] ss:$16 sps:$4 sm:$0xff]   ;;  %v3547_v23 = vld [vmem:[#allocation5 + $0x78c] ss:$16 sps:$4 sm:$0xff]  }
  0xf7   :  { %1882 = vmatprep.subr.bf16.mxu1 %v3455_v22  ;;  %v3544_v22 = vld [vmem:[#allocation5 + $0x58c] ss:$16 sps:$4 sm:$0xff]  }
  0xf9   :  { %1922 = vmatpush2.bf16.msra.mxu0 %v3456_v25  ;;  %v3545_v25 = vld [vmem:[#allocation5 + $0x788] ss:$16 sps:$4 sm:$0xff]  }
  0xfa   :  { %1883 = vmatpush2.bf16.msra.mxu1 %v3453_v24  ;;  %1923 = vmatprep.subr.bf16.mxu0 %v3464_v27  ;;  %v3542_v24 = vld [vmem:[#allocation5 + $0x588] ss:$16 sps:$4 sm:$0xff]   ;;  %v3553_v27 = vld [vmem:[#allocation5 + $0x76c] ss:$16 sps:$4 sm:$0xff]  }
  0xfb   :  { %1884 = vmatprep.subr.bf16.mxu1 %v3461_v26  ;;  %v3550_v26 = vld [vmem:[#allocation5 + $0x56c] ss:$16 sps:$4 sm:$0xff]  }
  0xfd   :  { %1924 = vmatpush2.bf16.msra.mxu0 %v3462_v29  ;;  %v3551_v29 = vld [vmem:[#allocation5 + $0x768] ss:$16 sps:$4 sm:$0xff]  }
  0xfe   :  { %1885 = vmatpush2.bf16.msra.mxu1 %v3459_v28  ;;  %1925 = vmatprep.subr.bf16.mxu0 %v3470_v31  ;;  %v3548_v28 = vld [vmem:[#allocation5 + $0x568] ss:$16 sps:$4 sm:$0xff]   ;;  %v3559_v31 = vld [vmem:[#allocation5 + $0x74c] ss:$16 sps:$4 sm:$0xff]  }
  0xff   :  { %1886 = vmatprep.subr.bf16.mxu1 %v3467_v30  ;;  %v3556_v30 = vld [vmem:[#allocation5 + $0x54c] ss:$16 sps:$4 sm:$0xff]  }
 0x101   :  { %1926 = vmatpush2.bf16.msra.mxu0 %v3468_v33  ;;  %v3557_v33 = vld [vmem:[#allocation5 + $0x748] ss:$16 sps:$4 sm:$0xff]  }
 0x102   :  { %1887 = vmatpush2.bf16.msra.mxu1 %v3465_v32  ;;  %1927 = vmatprep.subr.bf16.mxu0 %v3476_v36  ;;  %v3554_v32 = vld [vmem:[#allocation5 + $0x548] ss:$16 sps:$4 sm:$0xff]   ;;  %v3565_v36 = vld [vmem:[#allocation5 + $0x72c] ss:$16 sps:$4 sm:$0xff]  }
 0x103   :  { %1888 = vmatprep.subr.bf16.mxu1 %v3473_v35  ;;  %v3562_v35 = vld [vmem:[#allocation5 + $0x52c] ss:$16 sps:$4 sm:$0xff]  }
 0x105   :  { %1928 = vmatpush2.bf16.msra.mxu0 %v3474_v38  ;;  %v3563_v38 = vld [vmem:[#allocation5 + $0x728] ss:$16 sps:$4 sm:$0xff]  }
 0x106   :  { %1889 = vmatpush2.bf16.msra.mxu1 %v3471_v37  ;;  %1929 = vmatprep.subr.bf16.mxu0 %v3479_v40  ;;  %v3560_v37 = vld [vmem:[#allocation5 + $0x528] ss:$16 sps:$4 sm:$0xff]   ;;  %v3568_v40 = vld [vmem:[#allocation5 + $0x50c] ss:$16 sps:$4 sm:$0xff]  }
 0x107   :  { %1940 = vmatprep.subr.bf16.mxu1 %v3482_v41  ;;  %v3571_v41 = vld [vmem:[#allocation5 + $0x70c] ss:$16 sps:$4 sm:$0xff]  }
 0x109   :  { %1891 = vmatmul.mubr.bf16.vlgmr.msra.gmra.mxu1 %v3974_v16  ;;  %1930 = vmatpush2.bf16.msra.mxu0 %v3477_v42  ;;  %v3498_v16 = vld [vmem:[#allocation5 + $0x6a8] ss:$16 sps:$4 sm:$0xff]  }
 0x10a   :  { %1941 = vmatpush1.bf16.msra.mxu1 %v3480_v43  ;;  %1981 = vmatprep.subr.bf16.mxu0 %v3488_v45  ;;  %v3566_v42 = vld [vmem:[#allocation5 + $0x508] ss:$16 sps:$4 sm:$0xff]   ;;  %v3572_v45 = vld [vmem:[#allocation8 + $0x70] ss:$8 sps:$4 sm:$0xff]  }
 0x10b   :  { %1942 = vmatprep.subr.bf16.mxu1 %v3485_v44  ;;  %1972 = vmatprep.mubr.bf16.mxu1 %v3996_v55  ;;  %v3501_v55 = vld [vmem:[#allocation5 + $0x468] ss:$16 sps:$4 sm:$0xff]  }
 0x10c   :  { %1932 = vmatmul.mubr.bf16.vlgmr.msra.gmra.mxu0 %v3976_v17  ;;  %v3509_v17 = vld [vmem:[#allocation5 + $0x44c] ss:$16 sps:$4 sm:$0xff]   ;;  %v3569_v43 = vld [vmem:[#allocation5 + $0x708] ss:$16 sps:$4 sm:$0xff]  }
 0x10d   :  { %1982 = vmatpush1.bf16.msra.mxu0 %v3486_v48  ;;  %3079 = vmatprep.mubr.msk.bf16.mxu0 %vm1677_vm0, %v3986_v46  ;;  %v3518_v46 = vld [vmem:[#allocation5 + $0x64c] ss:$16 sps:$4 sm:$0xff]   ;;  %v3574_v44 = vld [vmem:[#allocation8 + $0x74] ss:$8 sps:$4 sm:$0xff]  }
 0x10e   :  { %1943 = vmatpush1.bf16.msra.mxu1 %v3483_v47  ;;  %1983 = vmatprep.subr.bf16.mxu0 %v3494_v50  ;;  %v3577_v47 = vld [vmem:[#allocation8 + $0x64] ss:$8 sps:$4 sm:$0xff]   ;;  %v3575_v48 = vld [vmem:[#allocation8 + $0x60] ss:$8 sps:$4 sm:$0xff]  }
 0x10f   :  { %1944 = vmatprep.subr.bf16.mxu1 %v3491_v49  ;;  %v3580_v49 = vld [vmem:[#allocation8 + $0x54] ss:$8 sps:$4 sm:$0xff]  }
 0x111   :  { %1984 = vmatpush1.bf16.msra.mxu0 %v3492_v56  ;;  %v3578_v56 = vld [vmem:[#allocation8 + $0x50] ss:$8 sps:$4 sm:$0xff]  }
 0x112   :  { %1945 = vmatpush1.bf16.msra.mxu1 %v3489_v51  ;;  %1985 = vmatprep.subr.bf16.mxu0 %v3500_v53 }
 0x113   :  { %1946 = vmatprep.subr.bf16.mxu1 %v3497_v52 }
 0x115   :  { %1986 = vmatpush1.bf16.msra.mxu0 %v3498_v16 }
 0x116   :  { %1947 = vmatpush1.bf16.msra.mxu1 %v3495_v54  ;;  %1987 = vmatprep.subr.bf16.mxu0 %v3506_v59  ;;  %v3583_v54 = vld [vmem:[#allocation8 + $0x44] ss:$8 sps:$4 sm:$0xff]  }
 0x117   :  { %1948 = vmatprep.subr.bf16.mxu1 %v3503_v58 }
 0x119   :  { %1988 = vmatpush1.bf16.msra.mxu0 %v3504_v57  ;;  %v3620_v57 = vld [vmem:[#allocation8 + $0x170] ss:$8 sps:$4 sm:$0xff]  }
 0x11a   :  { %1949 = vmatpush1.bf16.msra.mxu1 %v3501_v55  ;;  %1989 = vmatprep.subr.bf16.mxu0 %v3512_v60  ;;  %v3586_v55 = vld [vmem:[#allocation8 + $0x34] ss:$8 sps:$4 sm:$0xff]   ;;  %v3625_v60 = vld [vmem:[#allocation8 + $0x164] ss:$8 sps:$4 sm:$0xff]  }
 0x11b   :  { %1950 = vmatprep.subr.bf16.mxu1 %v3509_v17  ;;  %v3622_v17 = vld [vmem:[#allocation8 + $0x174] ss:$8 sps:$4 sm:$0xff]  }
 0x11d   :  { %1990 = vmatpush1.bf16.msra.mxu0 %v3510_v62  ;;  %v3623_v62 = vld [vmem:[#allocation8 + $0x160] ss:$8 sps:$4 sm:$0xff]  }
 0x11e   :  { %1951 = vmatpush1.bf16.msra.mxu1 %v3507_v61  ;;  %1991 = vmatprep.subr.bf16.mxu0 %v3518_v46  ;;  %v3584_v61 = vld [vmem:[#allocation8 + $0x30] ss:$8 sps:$4 sm:$0xff]   ;;  %v3628_v46 = vld [vmem:[#allocation8 + $0x154] ss:$8 sps:$4 sm:$0xff]  }
 0x11f   :  { %1952 = vmatprep.subr.bf16.mxu1 %v3515_v63  ;;  %v3589_v63 = vld [vmem:[#allocation8 + $0x24] ss:$8 sps:$4 sm:$0xff]  }
 0x121   :  { %1992 = vmatpush1.bf16.msra.mxu0 %v3516_v1  ;;  %v3626_v1 = vld [vmem:[#allocation8 + $0x150] ss:$8 sps:$4 sm:$0xff]  }
 0x122   :  { %1953 = vmatpush1.bf16.msra.mxu1 %v3513_v0  ;;  %1993 = vmatprep.subr.bf16.mxu0 %v3524_v3  ;;  %v3587_v0 = vld [vmem:[#allocation8 + $0x20] ss:$8 sps:$4 sm:$0xff]   ;;  %v3631_v3 = vld [vmem:[#allocation8 + $0x144] ss:$8 sps:$4 sm:$0xff]  }
 0x123   :  { %1954 = vmatprep.subr.bf16.mxu1 %v3521_v2  ;;  %v3592_v2 = vld [vmem:[#allocation8 + $0x14] ss:$8 sps:$4 sm:$0xff]  }
 0x125   :  { %1994 = vmatpush1.bf16.msra.mxu0 %v3522_v5  ;;  %v3629_v5 = vld [vmem:[#allocation8 + $0x140] ss:$8 sps:$4 sm:$0xff]  }
 0x126   :  { %1955 = vmatpush1.bf16.msra.mxu1 %v3519_v4  ;;  %1995 = vmatprep.subr.bf16.mxu0 %v3530_v7  ;;  %v3590_v4 = vld [vmem:[#allocation8 + $0x10] ss:$8 sps:$4 sm:$0xff]   ;;  %v3634_v7 = vld [vmem:[#allocation8 + $0x134] ss:$8 sps:$4 sm:$0xff]  }
 0x127   :  { %1956 = vmatprep.subr.bf16.mxu1 %v3527_v6  ;;  %v3595_v6 = vld [vmem:[#allocation8 + $0x4] ss:$8 sps:$4 sm:$0xff]  }
 0x129   :  { %1996 = vmatpush1.bf16.msra.mxu0 %v3528_v10  ;;  %v3598_v10 = vld [vmem:[#allocation8 + $0xf4] ss:$8 sps:$4 sm:$0xff]  }
 0x12a   :  { %1957 = vmatpush2.bf16.msra.mxu1 %v3525_v9  ;;  %3078 = vmatprep.subr.msk.bf16.mxu0 %vm1681_vm1, %v3075_v12  ;;  %v3632_v9 = vld [vmem:[#allocation8 + $0x130] ss:$8 sps:$4 sm:$0xff]  }
 0x12b   :  { %1958 = vmatprep.subr.bf16.mxu1 %v3533_v11  ;;  %v3637_v11 = vld [vmem:[#allocation8 + $0x124] ss:$8 sps:$4 sm:$0xff]   ;;  %v3596_v12 = vld [vmem:[#allocation8 + $0xf0] ss:$8 sps:$4 sm:$0xff]  }
 0x12d   :  { %2000 = vmatpush2.bf16.msra.mxu0 %v1689_v15  ;;  %v3640_v15 = vld [vmem:[#allocation8 + $0x114] ss:$8 sps:$4 sm:$0xff]  }
 0x12e   :  { %1959 = vmatpush2.bf16.msra.mxu1 %v3531_v14  ;;  %2001 = vmatprep.subr.bf16.mxu0 %v3541_v19  ;;  %v3601_v14 = vld [vmem:[#allocation8 + $0xe4] ss:$8 sps:$4 sm:$0xff]   ;;  %v3638_v19 = vld [vmem:[#allocation8 + $0x110] ss:$8 sps:$4 sm:$0xff]  }
 0x12f   :  { %1960 = vmatprep.subr.bf16.mxu1 %v3538_v18  ;;  %v3599_v18 = vld [vmem:[#allocation8 + $0xe0] ss:$8 sps:$4 sm:$0xff]  }
 0x131   :  { %2002 = vmatpush2.bf16.msra.mxu0 %v3539_v21  ;;  %v3643_v21 = vld [vmem:[#allocation8 + $0x104] ss:$8 sps:$4 sm:$0xff]  }
 0x132   :  { %1961 = vmatpush2.bf16.msra.mxu1 %v3536_v20  ;;  %2003 = vmatprep.subr.bf16.mxu0 %v3547_v23  ;;  %v3604_v20 = vld [vmem:[#allocation8 + $0xd4] ss:$8 sps:$4 sm:$0xff]   ;;  %v3641_v23 = vld [vmem:[#allocation8 + $0x100] ss:$8 sps:$4 sm:$0xff]  }
 0x133   :  { %1962 = vmatprep.subr.bf16.mxu1 %v3544_v22  ;;  %v3602_v22 = vld [vmem:[#allocation8 + $0xd0] ss:$8 sps:$4 sm:$0xff]  }
 0x135   :  { %2004 = vmatpush2.bf16.msra.mxu0 %v3545_v25  ;;  %v3646_v25 = vld [vmem:[#allocation8 + $0x1f4] ss:$8 sps:$4 sm:$0xff]  }
 0x136   :  { %1963 = vmatpush2.bf16.msra.mxu1 %v3542_v24  ;;  %2005 = vmatprep.subr.bf16.mxu0 %v3553_v27  ;;  %v3607_v24 = vld [vmem:[#allocation8 + $0xc4] ss:$8 sps:$4 sm:$0xff]   ;;  %v3644_v27 = vld [vmem:[#allocation8 + $0x1f0] ss:$8 sps:$4 sm:$0xff]  }
 0x137   :  { %1964 = vmatprep.subr.bf16.mxu1 %v3550_v26  ;;  %v3605_v26 = vld [vmem:[#allocation8 + $0xc0] ss:$8 sps:$4 sm:$0xff]  }
 0x139   :  { %2006 = vmatpush2.bf16.msra.mxu0 %v3551_v29  ;;  %v3649_v29 = vld [vmem:[#allocation8 + $0x1e4] ss:$8 sps:$4 sm:$0xff]  }
 0x13a   :  { %1965 = vmatpush2.bf16.msra.mxu1 %v3548_v28  ;;  %2007 = vmatprep.subr.bf16.mxu0 %v3559_v31  ;;  %v3610_v28 = vld [vmem:[#allocation8 + $0xb4] ss:$8 sps:$4 sm:$0xff]   ;;  %v3647_v31 = vld [vmem:[#allocation8 + $0x1e0] ss:$8 sps:$4 sm:$0xff]  }
 0x13b   :  { %1966 = vmatprep.subr.bf16.mxu1 %v3556_v30  ;;  %v3608_v30 = vld [vmem:[#allocation8 + $0xb0] ss:$8 sps:$4 sm:$0xff]  }
 0x13d   :  { %2008 = vmatpush2.bf16.msra.mxu0 %v3557_v33  ;;  %v3652_v33 = vld [vmem:[#allocation8 + $0x1d4] ss:$8 sps:$4 sm:$0xff]  }
 0x13e   :  { %1967 = vmatpush2.bf16.msra.mxu1 %v3554_v32  ;;  %2009 = vmatprep.subr.bf16.mxu0 %v3565_v36  ;;  %v3613_v32 = vld [vmem:[#allocation8 + $0xa4] ss:$8 sps:$4 sm:$0xff]   ;;  %v3611_v36 = vld [vmem:[#allocation8 + $0xa0] ss:$8 sps:$4 sm:$0xff]  }
 0x13f   :  { %1968 = vmatprep.subr.bf16.mxu1 %v3562_v35  ;;  %v407_v35 = vlaneseq }
 0x141   :  { %2010 = vmatpush2.bf16.msra.mxu0 %v3563_v38  ;;  %v3616_v38 = vld [vmem:[#allocation8 + $0x94] ss:$8 sps:$4 sm:$0xff]  }
 0x142   :  { %1969 = vmatpush2.bf16.msra.mxu1 %v3560_v37  ;;  %2011 = vmatprep.subr.bf16.mxu0 %v3571_v41  ;;  %v3650_v37 = vld [vmem:[#allocation8 + $0x1d0] ss:$8 sps:$4 sm:$0xff]   ;;  %v4038_v41 = vshrl.u32 %v407_v35, 7 }
 0x143   :  { %1970 = vmatprep.subr.bf16.mxu1 %v3568_v40  ;;  %v3655_v40 = vld [vmem:[#allocation8 + $0x1c4] ss:$8 sps:$4 sm:$0xff]  }
 0x145   :  { %2012 = vmatpush2.bf16.msra.mxu0 %v3569_v43  ;;  %v3653_v43 = vld [vmem:[#allocation8 + $0x1c0] ss:$8 sps:$4 sm:$0xff]  }
 0x146   :  { %1971 = vmatpush2.bf16.msra.mxu1 %v3566_v42  ;;  %2434 = vmatprep.subr.bf16.mxu0 %v3574_v44  ;;  %v3614_v42 = vld [vmem:[#allocation8 + $0x90] ss:$8 sps:$4 sm:$0xff]   ;;  %v3619_v44 = vld [vmem:[#allocation8 + $0x84] ss:$8 sps:$4 sm:$0xff]  }
 0x147   :  { %2475 = vmatprep.subr.bf16.mxu1 %v3622_v17 }
 0x148   :  { %2014 = vmatmul.mubr.bf16.vlgmr.msra.gmra.mxu0 %v4013_v34  ;;  %v3581_v34 = vld [vmem:[#allocation8 + $0x40] ss:$8 sps:$4 sm:$0xff]  }
 0x149   :  { %1973 = vmatmul.mubr.bf16.vlgmr.msra.gmra.mxu1 %v4016_v39  ;;  %2435 = vmatpush1.bf16.msra.mxu0 %v3572_v45  ;;  %v3658_v45 = vld [vmem:[#allocation8 + $0x1b4] ss:$8 sps:$4 sm:$0xff]  }
 0x14a   :  { %2436 = vmatprep.subr.bf16.mxu0 %v3577_v47  ;;  %2476 = vmatpush1.bf16.msra.mxu1 %v3620_v57  ;;  %v4041_v47 = vsub.s32 0, %v4038_v41  ;;  %v3659_v57 = vld [vmem:[#allocation8 + $0x1a0] ss:$8 sps:$4 sm:$0xff]  }
 0x14b   :  { %2477 = vmatprep.subr.bf16.mxu1 %v3625_v60 }
 0x14c   :  { %v4030_v50 = vpop.f32.mrf.mxu0 }
 0x14d   :  { %v4032_v51 = vpop.f32.mrf.mxu1  ;;  %2437 = vmatpush1.bf16.msra.mxu0 %v3575_v48  ;;  %v405_v48 = vld [vmem:[#allocation7] sm:$0xf] }
 0x14e   :  { %v4034_v52 = vpop.f32.mrf.mxu0  ;;  %2438 = vmatprep.subr.bf16.mxu0 %v3580_v49  ;;  %2478 = vmatpush1.bf16.msra.mxu1 %v3623_v62  ;;  %v4044_v49 = vsub.s32 1, %v4038_v41 }
 0x14f   :  { %v4036_v53 = vpop.f32.mrf.mxu1  ;;  %2479 = vmatprep.subr.bf16.mxu1 %v3628_v46 }
 0x150   :  { %v1732_v16 = vpop.f32.mrf.mxu0 }
 0x151   :  { %v1773_v39 = vpop.f32.mrf.mxu1  ;;  %2439 = vmatpush1.bf16.msra.mxu0 %v3578_v56  ;;  %v3617_v56 = vld [vmem:[#allocation8 + $0x80] ss:$8 sps:$4 sm:$0xff]   ;;  %v410_v16 = vrot.slane %v405_v48, %v4041_v47 }
 0x152   :  { %v1733_v58 = vpop.f32.mrf.mxu0  ;;  %2440 = vmatprep.subr.bf16.mxu0 %v3583_v54  ;;  %2480 = vmatpush1.bf16.msra.mxu1 %v3626_v1  ;;  %v3656_v54 = vld [vmem:[#allocation8 + $0x1b0] ss:$8 sps:$4 sm:$0xff]   ;;  %v414_v39 = vrot.slane %v405_v48, %v4044_v49 }
 0x153   :  { %v1774_v59 = vpop.f32.mrf.mxu1  ;;  %2481 = vmatprep.subr.bf16.mxu1 %v3631_v3  ;;  %v3662_v1 = vld [vmem:[#allocation8 + $0x190] ss:$8 sps:$4 sm:$0xff]  }
 0x154   :  { %v3661_v59 = vld [vmem:[#allocation8 + $0x1a4] ss:$8 sps:$4 sm:$0xff]  }
 0x155   :  { %2441 = vmatpush1.bf16.msra.mxu0 %v3581_v34  ;;  %v1729_v34 = vadd.f32 %v4030_v50, %v410_v16  ;;  %v2029_v16 = vld [vmem:[#allocation2 + $0x18] sm:$0xff] }
 0x156   :  { %2442 = vmatprep.subr.bf16.mxu0 %v3586_v55  ;;  %2482 = vmatpush1.bf16.msra.mxu1 %v3629_v5  ;;  %v1731_v55 = vadd.f32 %v4034_v52, %v414_v39  ;;  %v3667_v5 = vld [vmem:[#allocation8 + $0x184] ss:$8 sps:$4 sm:$0xff]  }
 0x157   :  { %2483 = vmatprep.subr.bf16.mxu1 %v3634_v7  ;;  %v1770_v60 = vadd.f32 %v4032_v51, %v1729_v34  ;;  %v2026_v7 = vld [vmem:[#allocation2] sm:$0xff]  ;;  %v3665_v51 = vld [vmem:[#allocation8 + $0x180] ss:$8 sps:$4 sm:$0xff]  }
 0x158   :  { %v1772_v46 = vadd.f32 %v4036_v53, %v1731_v55 }
 0x159   :  { %2443 = vmatpush1.bf16.msra.mxu0 %v3584_v61 }
 0x15a   :  { %2444 = vmatprep.subr.bf16.mxu0 %v3589_v63  ;;  %2484 = vmatpush1.bf16.msra.mxu1 %v3632_v9  ;;  %v3664_v63 = vld [vmem:[#allocation8 + $0x194] ss:$8 sps:$4 sm:$0xff]  }
 0x15b   :  { %2485 = vmatprep.subr.bf16.mxu1 %v3637_v11 }
 0x15d   :  { %2445 = vmatpush1.bf16.msra.mxu0 %v3587_v0 }
 0x15e   :  { %2446 = vmatprep.subr.bf16.mxu0 %v3592_v2  ;;  %2486 = vmatpush1.bf16.msra.mxu1 %v3635_v13 }
 0x15f   :  { %2487 = vmatprep.subr.bf16.mxu1 %v3640_v15 }
 0x161   :  { %2447 = vmatpush1.bf16.msra.mxu0 %v3590_v4 }
 0x162   :  { %2448 = vmatprep.subr.bf16.mxu0 %v3595_v6  ;;  %2488 = vmatpush1.bf16.msra.mxu1 %v3638_v19 }
 0x163   :  { %2489 = vmatprep.subr.bf16.mxu1 %v3643_v21 }
 0x165   :  { %2449 = vmatpush1.bf16.msra.mxu0 %v3593_v8 }
 0x166   :  { %2450 = vmatprep.subr.bf16.mxu0 %v3598_v10  ;;  %2490 = vmatpush1.bf16.msra.mxu1 %v3641_v23  ;;  %v2027_v10 = vld [vmem:[#allocation2 + $0x8] sm:$0xff] }
 0x167   :  { %2491 = vmatprep.subr.bf16.mxu1 %v3646_v25  ;;  %v417_v25 = vsub.s32 2, %v4038_v41 }
 0x169   :  { %2451 = vmatpush2.bf16.msra.mxu0 %v3596_v12 }
 0x16a   :  { %2452 = vmatprep.subr.bf16.mxu0 %v3601_v14  ;;  %2492 = vmatpush2.bf16.msra.mxu1 %v3644_v27  ;;  %v421_v27 = vsub.s32 3, %v4038_v41 }
 0x16b   :  { %2493 = vmatprep.subr.bf16.mxu1 %v3649_v29 }
 0x16c   :  { %v422_v29 = vrot.slane %v405_v48, %v421_v27 }
 0x16d   :  { %2453 = vmatpush2.bf16.msra.mxu0 %v3599_v18 }
 0x16e   :  { %2454 = vmatprep.subr.bf16.mxu0 %v3604_v20  ;;  %2494 = vmatpush2.bf16.msra.mxu1 %v3647_v31 }
 0x16f   :  { %2495 = vmatprep.subr.bf16.mxu1 %v3652_v33 }
 0x171   :  { %2455 = vmatpush2.bf16.msra.mxu0 %v3602_v22 }
 0x172   :  { %2456 = vmatprep.subr.bf16.mxu0 %v3607_v24  ;;  %2496 = vmatpush2.bf16.msra.mxu1 %v3650_v37 }
 0x173   :  { %2497 = vmatprep.subr.bf16.mxu1 %v3655_v40 }
 0x175   :  { %2457 = vmatpush2.bf16.msra.mxu0 %v3605_v26  ;;  %v418_v26 = vrot.slane %v405_v48, %v417_v25 }
 0x176   :  { %2458 = vmatprep.subr.bf16.mxu0 %v3610_v28  ;;  %2498 = vmatpush2.bf16.msra.mxu1 %v3653_v43 }
 0x177   :  { %2499 = vmatprep.subr.bf16.mxu1 %v3658_v45 }
 0x179   :  { %2459 = vmatpush2.bf16.msra.mxu0 %v3608_v30 }
 0x17a   :  { %2460 = vmatprep.subr.bf16.mxu0 %v3613_v32  ;;  %2500 = vmatpush2.bf16.msra.mxu1 %v3656_v54 }
 0x17b   :  { %2501 = vmatprep.subr.bf16.mxu1 %v3661_v59 }
 0x17d   :  { %2461 = vmatpush2.bf16.msra.mxu0 %v3611_v36 }
 0x17e   :  { %2462 = vmatprep.subr.bf16.mxu0 %v3616_v38  ;;  %2502 = vmatpush2.bf16.msra.mxu1 %v3659_v57 }
 0x17f   :  { %2503 = vmatprep.subr.bf16.mxu1 %v3664_v63  ;;  %v3669_v63 = vld [vmem:[%s4142_s10 + $0x38] sm:$0xff]  }
 0x181   :  { %2463 = vmatpush2.bf16.msra.mxu0 %v3614_v42 }
 0x182   :  { %2464 = vmatprep.subr.bf16.mxu0 %v3619_v44  ;;  %2504 = vmatpush2.bf16.msra.mxu1 %v3662_v1  ;;  %v3672_v1 = vld [vmem:[%s4142_s10 + $0x68] sm:$0xff]  }
 0x183   :  { %2505 = vmatprep.subr.bf16.mxu1 %v3667_v5  ;;  %v3678_v5 = vld [vmem:[%s4142_s10 + $0x50] sm:$0xff]  }
 0x185   :  { %2465 = vmatpush2.bf16.msra.mxu0 %v3617_v56  ;;  %v2028_v56 = vld [vmem:[#allocation2 + $0x10] sm:$0xff] }
 0x186   :  { %2506 = vmatpush2.bf16.msra.mxu1 %v3665_v51  ;;  %v3682_v51 = vld [vmem:[%s4142_s10 + $0x40] sm:$0xff]  }
 0x189   :  { %v1851_v58 = vpop.f32.mrf.mxu1 }
 0x18b   :  { %v1853_v17 = vpop.f32.mrf.mxu1 }
 0x18c   :  { %v1810_v61 = vpop.f32.mrf.mxu0 }
 0x18d   :  { %v1855_v62 = vpop.f32.mrf.mxu1  ;;  %v1811_v0 = vadd.f32 %v1810_v61, %v1770_v60 }
 0x18e   :  { %v1812_v2 = vpop.f32.mrf.mxu0  ;;  %v3668_v62 = vld [vmem:[%s4142_s10 + $0x78] sm:$0xff]  }
 0x18f   :  { %v1856_v3 = vpop.f32.mrf.mxu1  ;;  %v1852_v50 = vadd.f32 %v1851_v58, %v1811_v0  ;;  %v1813_v4 = vadd.f32 %v1812_v2, %v1772_v46  ;;  %3163 = vmatprep.subr.bf16.mxu0 %v3668_v62  ;;  %v3670_v46 = vld [vmem:[%s4142_s10 + $0x70] sm:$0xff]   ;;  %v3673_v2 = vld [vmem:[%s4142_s10 + $0x28] sm:$0xff]  }
 0x190   :  { %v1814_v52 = vpop.f32.mrf.mxu0  ;;  %v3671_v0 = vld [vmem:[%s4142_s10 + $0x30] sm:$0xff]   ;;  %v3674_v3 = vld [vmem:[%s4142_s10 + $0x60] sm:$0xff]  }
 0x191   :  { %v2022_v6 = vmax.f32 %v1852_v50, 0.0  ;;  %v1854_v8 = vadd.f32 %v1853_v17, %v1813_v4  ;;  %v3675_v50 = vld [vmem:[%s4142_s10 + $0x20] sm:$0xff]   ;;  %v3676_v4 = vld [vmem:[%s4142_s10 + $0x58] sm:$0xff]  }
 0x192   :  { %v1815_v9 = vpop.f32.mrf.mxu0  ;;  %v3677_v52 = vld [vmem:[%s4142_s10 + $0x18] sm:$0xff]  }
 0x193   :  { %v2023_v11 = vmax.f32 %v1854_v8, 0.0  ;;  %v2030_v53 = vmul.f32 %v2026_v7, %v2022_v6  ;;  %v3679_v6 = vld [vmem:[%s4142_s10 + $0x10] sm:$0xff]   ;;  %v3680_v7 = vld [vmem:[%s4142_s10 + $0x48] sm:$0xff]   ;;  %v3683_v9 = vld [vmem:[%s4142_s10] sm:$0xff]  }
 0x194   :  { %v3681_v8 = vld [vmem:[%s4142_s10 + $0x8] sm:$0xff]  }
 0x195   :  { %v2031_v12 = vmul.f32 %v2027_v10, %v2023_v11  ;;  %v2034_v14 = vpack.c.bf16 %v2030_v53, %v2030_v53  ;;  %v2102_v10 = vld [vmem:[%s4139_s7] sm:$0x3] }
 0x196   :  { %v2107_v11 = vrot.slane %v2102_v10, %v4041_v47  ;;  %v2111_v53 = vrot.slane %v2102_v10, %v4044_v49 }
 0x197   :  { %v2035_v13 = vpack.c.bf16 %v2031_v12, %v2031_v12 }
 0x199   :  { %2466 = vmatprep.mubr.bf16.mxu0 %v2035_v13 }
 0x19a   :  { %2467 = vmatmul.mubr.bf16.vlgmr.msra.gmra.mxu0 %v2034_v14 }
 0x19b   :  { %3164 = vmatpush3.bf16.msra.mxu0 %v3669_v63  ;;  %v2517_v63 = vld [vmem:[#allocation11] sm:$0x3] }
 0x19c   :  { %3165 = vmatprep.subr.bf16.mxu0 %v3670_v46 }
 0x19f   :  { %3166 = vmatpush3.bf16.msra.mxu0 %v3671_v0 }
 0x1a0   :  { %3167 = vmatprep.subr.bf16.mxu0 %v3672_v1  ;;  %v2574_v1 = vrot.slane %v2517_v63, %v4041_v47 }
 0x1a3   :  { %3168 = vmatpush3.bf16.msra.mxu0 %v3673_v2 }
 0x1a4   :  { %3169 = vmatprep.subr.bf16.mxu0 %v3674_v3 }
 0x1a7   :  { %3170 = vmatpush3.bf16.msra.mxu0 %v3675_v50 }
 0x1a8   :  { %3171 = vmatprep.subr.bf16.mxu0 %v3676_v4  ;;  %v2578_v4 = vrot.slane %v2517_v63, %v4044_v49 }
 0x1ab   :  { %3172 = vmatpush3.bf16.msra.mxu0 %v3677_v52 }
 0x1ac   :  { %3173 = vmatprep.subr.bf16.mxu0 %v3678_v5 }
 0x1af   :  { %3174 = vmatpush3.bf16.msra.mxu0 %v3679_v6 }
 0x1b0   :  { %3175 = vmatprep.subr.bf16.mxu0 %v3680_v7 }
 0x1b3   :  { %3176 = vmatpush3.bf16.msra.mxu0 %v3681_v8 }
 0x1b4   :  { %3177 = vmatprep.subr.bf16.mxu0 %v3682_v51  ;;  %v2585_v51 = vld [vmem:[%s4135_s3] sm:$0xff] }
 0x1b7   :  { %3178 = vmatpush3.bf16.msra.mxu0 %v3683_v9  ;;  %v2586_v9 = vld [vmem:[%s4135_s3 + $0x8] sm:$0xff] }
 0x1c9   :  { %v1892_v15 = vpop.f32.mrf.mxu1 }
 0x1ca   :  { %v1893_v28 = vadd.f32 %v1892_v15, %v418_v26 }
 0x1cb   :  { %v1894_v18 = vpop.f32.mrf.mxu1 }
 0x1cc   :  { %v1933_v20 = vpop.f32.mrf.mxu0  ;;  %v1895_v30 = vadd.f32 %v1894_v18, %v422_v29 }
 0x1cd   :  { %v1896_v19 = vpop.f32.mrf.mxu1  ;;  %v1934_v31 = vadd.f32 %v1933_v20, %v1893_v28 }
 0x1ce   :  { %v1935_v22 = vpop.f32.mrf.mxu0 }
 0x1cf   :  { %v1897_v21 = vpop.f32.mrf.mxu1  ;;  %v1936_v35 = vadd.f32 %v1935_v22, %v1895_v30 }
 0x1d0   :  { %v1937_v23 = vpop.f32.mrf.mxu0 }
 0x1d2   :  { %v1938_v24 = vpop.f32.mrf.mxu0 }
 0x208   :  { %v2015_v33 = vpop.f32.mrf.mxu0 }
 0x209   :  { %v1974_v32 = vpop.f32.mrf.mxu1 }
 0x20a   :  { %v1975_v36 = vadd.f32 %v1974_v32, %v1934_v31  ;;  %v2017_v38 = vpop.f32.mrf.mxu0 }
 0x20b   :  { %v1976_v37 = vpop.f32.mrf.mxu1 }
 0x20c   :  { %v2016_v40 = vadd.f32 %v2015_v33, %v1975_v36  ;;  %v1977_v42 = vadd.f32 %v1976_v37, %v1936_v35  ;;  %v2019_v44 = vpop.f32.mrf.mxu0 }
 0x20d   :  { %v1978_v43 = vpop.f32.mrf.mxu1 }
 0x20e   :  { %v2024_v45 = vmax.f32 %v2016_v40, 0.0  ;;  %v2018_v54 = vadd.f32 %v2017_v38, %v1977_v42  ;;  %v2020_v41 = vpop.f32.mrf.mxu0 }
 0x20f   :  { %v1979_v39 = vpop.f32.mrf.mxu1 }
 0x210   :  { %v2025_v34 = vmax.f32 %v2018_v54, 0.0  ;;  %v2032_v48 = vmul.f32 %v2028_v56, %v2024_v45 }
 0x212   :  { %v2033_v58 = vmul.f32 %v2029_v16, %v2025_v34  ;;  %v2036_v55 = vpack.c.bf16 %v2032_v48, %v2032_v48 }
 0x214   :  { %v2037_v59 = vpack.c.bf16 %v2033_v58, %v2033_v58 }
 0x216   :  { %2507 = vmatprep.mubr.bf16.mxu1 %v2037_v59 }
 0x217   :  { %2508 = vmatmul.mubr.bf16.vlgmr.msra.gmra.mxu1 %v2036_v55 }
 0x25a   :  { %v2468_v57 = vpop.f32.mrf.mxu0 }
 0x25b   :  { %v2469_v12 = vadd.f32 %v2468_v57, %v2107_v11 }
 0x25c   :  { %v2470_v17 = vpop.f32.mrf.mxu0 }
 0x25d   :  { %v2471_v14 = vadd.f32 %v2470_v17, %v2111_v53 }
 0x25e   :  { %v2472_v60 = vpop.f32.mrf.mxu0 }
 0x260   :  { %v2473_v61 = vpop.f32.mrf.mxu0 }
 0x261   :  { %v2516_v61 = vld [vmem:[#allocation10] sm:$0x3] }
 0x262   :  { %v2555_v62 = vrot.slane %v2516_v61, %v4041_v47  ;;  %v2559_v46 = vrot.slane %v2516_v61, %v4044_v49 }
 0x2d7   :  { %v2509_v13 = vpop.f32.mrf.mxu1 }
 0x2d8   :  { %v2510_v15 = vadd.f32 %v2509_v13, %v2469_v12  ;;  %v3144_v13 = vld [vmem:[%s4143_s11] ss:$0 sm:$0xff] }
 0x2d9   :  { %v2511_v18 = vpop.f32.mrf.mxu1 }
 0x2da   :  { %v2518_v19 = vrot.slane %v2510_v15, 4  ;;  %v2512_v20 = vadd.f32 %v2511_v18, %v2471_v14 }
 0x2db   :  { %v2513_v21 = vpop.f32.mrf.mxu1 }
 0x2dc   :  { %v2519_v22 = vadd.f32 %v2518_v19, %v2510_v15  ;;  %v2524_v23 = vrot.slane %v2512_v20, 4 }
 0x2dd   :  { %v2514_v24 = vpop.f32.mrf.mxu1 }
 0x2de   :  { %v2520_v25 = vrot.slane %v2519_v22, 2  ;;  %v2525_v26 = vadd.f32 %v2524_v23, %v2512_v20 }
 0x2e0   :  { %v2521_v27 = vadd.f32 %v2520_v25, %v2519_v22  ;;  %v2526_v28 = vrot.slane %v2525_v26, 2 }
 0x2e2   :  { %v2522_v29 = vrot.slane %v2521_v27, 1  ;;  %v2527_v30 = vadd.f32 %v2526_v28, %v2525_v26 }
 0x2e4   :  { %v2523_v31 = vadd.f32 %v2522_v29, %v2521_v27  ;;  %v2528_v32 = vrot.slane %v2527_v30, 1 }
 0x2e6   :  { %v2531_v33 = vmul.f32 0.125, %v2523_v31  ;;  %v2529_v35 = vadd.f32 %v2528_v32, %v2527_v30 }
 0x2e8   :  { %v2533_v36 = vsub.f32 %v2510_v15, %v2531_v33  ;;  %v2532_v37 = vmul.f32 0.125, %v2529_v35 }
 0x2ea   :  { %v2535_v38 = vmul.f32 %v2533_v36, %v2533_v36  ;;  %v2534_v40 = vsub.f32 %v2512_v20, %v2532_v37  ;;  %v2562_v0 = vmul.f32 %v2555_v62, %v2533_v36 }
 0x2ec   :  { %v2537_v42 = vrot.slane %v2535_v38, 4  ;;  %v2536_v43 = vmul.f32 %v2534_v40, %v2534_v40  ;;  %v2563_v50 = vmul.f32 %v2559_v46, %v2534_v40 }
 0x2ee   :  { %v2538_v44 = vadd.f32 %v2537_v42, %v2535_v38  ;;  %v2543_v45 = vrot.slane %v2536_v43, 4 }
 0x2f0   :  { %v2539_v56 = vrot.slane %v2538_v44, 2  ;;  %v2544_v54 = vadd.f32 %v2543_v45, %v2536_v43  ;;  %v3161_v43 = vld [vmem:[%s4144_s12] ss:$0 sm:$0xff] }
 0x2f2   :  { %v2540_v16 = vadd.f32 %v2539_v56, %v2538_v44  ;;  %v2545_v39 = vrot.slane %v2544_v54, 2  ;;  %v3162_v56 = vld [vmem:[%s4145_s13] ss:$0 sm:$0xff] }
 0x2f4   :  { %v2541_v41 = vrot.slane %v2540_v16, 1  ;;  %v2546_v34 = vadd.f32 %v2545_v39, %v2544_v54 }
 0x2f6   :  { %v2542_v48 = vadd.f32 %v2541_v41, %v2540_v16  ;;  %v2547_v58 = vrot.slane %v2546_v34, 1 }
 0x2f8   :  { %v2549_v59 = vmul.f32 0.125, %v2542_v48  ;;  %v2548_v55 = vadd.f32 %v2547_v58, %v2546_v34 }
 0x2fa   :  { %v2564_v57 = vadd.f32 1e-05, %v2549_v59  ;;  %v2550_v17 = vmul.f32 0.125, %v2548_v55 }
 0x2fc   :  { %3684 = vrsqrt.f32 %v2564_v57  ;;  %v2565_v60 = vadd.f32 1e-05, %v2550_v17 }
 0x2fe   :  { %3686 = vrsqrt.f32 %v2565_v60 }
 0x309   :  { %v3685_v2 = vpop.eup %3684 }
 0x30a   :  { %v2568_v3 = vmul.f32 %v3685_v2, %v2562_v0 }
 0x30b   :  { %v3687_v52 = vpop.eup %3686 }
 0x30c   :  { %v2569_v5 = vmul.f32 %v3687_v52, %v2563_v50  ;;  %v2581_v6 = vadd.f32 %v2574_v1, %v2568_v3 }
 0x30e   :  { %v2582_v7 = vadd.f32 %v2578_v4, %v2569_v5  ;;  %v2583_v8 = vmax.f32 %v2581_v6, 0.0 }
 0x310   :  { %v2584_v10 = vmax.f32 %v2582_v7, 0.0  ;;  %v2587_v47 = vmul.f32 %v2585_v51, %v2583_v8 }
 0x312   :  { %v2588_v11 = vmul.f32 %v2586_v9, %v2584_v10  ;;  %v2589_v12 = vpack.c.bf16 %v2587_v47, %v2587_v47 }
 0x314   :  { %v2590_v53 = vpack.c.bf16 %v2588_v11, %v2588_v11 }
 0x316   :  { %2758 = vmatprep.mubr.bf16.mxu0 %v2590_v53 }
 0x317   :  { %2759 = vmatmul.mubr.bf16.vlgmr.msra.gmra.mxu0 %v2589_v12 }
 0x3d7   :  { %v3179_v49 = vpop.f32.mrf.mxu0 }
 0x3d9   :  { %v3180_v14 = vpop.f32.mrf.mxu0 }
 0x3da   :  { %v3181_v15 = vadd.f32 %v3180_v14, %v3179_v49 }
 0x3db   :  { %v3182_v18 = vpop.f32.mrf.mxu0 }
 0x3dc   :  { %v2761_v19 = vadd.f32 %v3181_v15, %v3144_v13 }
 0x3dd   :  { %v3183_v20 = vpop.f32.mrf.mxu0 }
 0x3de   :  { %v2769_v21 = vsel %vm2768_vm2, %v2761_v19, 0.0 }
 0x3df   :  { %v2770_v22 = vrot.slane %v2769_v21, 4 }
 0x3e1   :  { %v2771_v23 = vadd.f32 %v2770_v22, %v2769_v21 }
 0x3e3   :  { %v2772_v24 = vrot.slane %v2771_v23, 2 }
 0x3e5   :  { %v2773_v25 = vadd.f32 %v2772_v24, %v2771_v23 }
 0x3e7   :  { %v2774_v26 = vrot.slane %v2773_v25, 1 }
 0x3e9   :  { %v2775_v27 = vadd.f32 %v2774_v26, %v2773_v25 }
 0x3eb   :  { %v2776_v28 = vmul.f32 0.125, %v2775_v27 }
 0x3ed   :  { %v2777_v29 = vsub.f32 %v2761_v19, %v2776_v28 }
 0x3ef   :  { %v2778_v30 = vmul.f32 %v2777_v29, %v2777_v29  ;;  %v2793_v44 = vmul.f32 %v3161_v43, %v2777_v29 }
 0x3f1   :  { %v2779_v31 = vsel %vm2768_vm2, %v2778_v30, 0.0 }
 0x3f2   :  { %v2780_v32 = vrot.slane %v2779_v31, 4 }
 0x3f4   :  { %v2781_v33 = vadd.f32 %v2780_v32, %v2779_v31 }
 0x3f6   :  { %v2782_v35 = vrot.slane %v2781_v33, 2 }
 0x3f8   :  { %v2783_v36 = vadd.f32 %v2782_v35, %v2781_v33 }
 0x3fa   :  { %v2784_v37 = vrot.slane %v2783_v36, 1 }
 0x3fc   :  { %v2785_v38 = vadd.f32 %v2784_v37, %v2783_v36 }
 0x3fe   :  { %v2786_v40 = vmul.f32 0.125, %v2785_v38 }
 0x400   :  { %v2794_v42 = vadd.f32 1e-05, %v2786_v40 }
 0x402   :  { %3688 = vrsqrt.f32 %v2794_v42 }
 0x40f   :  { %v3689_v45 = vpop.eup %3688 }
 0x410   :  { %v2796_v54 = vmul.f32 %v3689_v45, %v2793_v44 }
 0x412   :  { %v2803_v16 = vadd.f32 %v3162_v56, %v2796_v54 }
 0x414   :  { %v2804_v39 = vmax.f32 %v2803_v16, 0.0 }
 0x416   :  { %2805 = vst.msk [vmem:[#allocation13] sm:$0xff] %vm2768_vm2, %v2804_v39 }
 0x417   :  { %3821 = shalt.err (!%p3818_p6)
}
 0x418   :  { %2815 = dma.vmem_to_hbm [thread:$0]  %s2813_s28, 128, %s4146_s14, [#allocation4]  }
 0x419   :  { %3838 = dma.done.wait [#allocation4], 128  }
 0x41a   :  { %3839 = vsyncadd [#allocation4], 4294967168 }
 0x41b   :  { %2819 = vsyncpa [#allocation3], 1 }
 0x41c   :  { %2820 = vsyncpa [#allocation6], 1 }
 0x41d   :  { %2821 = vsyncpa [#allocation9], 1 }
 0x41e   :  { %2822 = vsyncpa [#allocation12], 1 }
 0x41f   :  { %2823 = vsyncpa [#allocation4], 1 }

</bundles_post_ra>
